<compile_context>
chip_gen: v5e
topology: v5e:2x2
jax: 0.10.0
libtpu: 0.0.40
codegen_flags: <defaults>
</compile_context>

<pallas_src>
import functools

import jax
import jax.numpy as jnp
from jax import lax
from jax.experimental import pallas as pl
from jax.experimental.pallas import tpu as pltpu


def _make_kernel(ks, dilation, num_groups, mfd, nf, b_tile,
                 eps=1e-5, neg_slope=0.01):
    G = num_groups
    cg = mfd // G
    pad = (ks - 1) * dilation // 2
    L = b_tile * nf
    inv_n = 1.0 / (cg * nf)

    def kernel(x_ref, w2_ref, p_ref, o_ref):
        # x_ref : (mfd, L)        channels-major slab, column j = b*nf + n
        # w2_ref: (mfd, ks*mfd)   fused per-tap block-diagonal grouped weights
        # p_ref : (mfd, 3)        packed [conv bias | gn gamma | gn beta]
        # o_ref : (mfd, L)
        x = x_ref[...]                                    # (mfd, L) f32
        w2 = w2_ref[...]
        bias = p_ref[:, 0:1]                              # (mfd, 1)
        gamma = p_ref[:, 1:2].reshape(G, cg, 1, 1)
        beta = p_ref[:, 2:3].reshape(G, cg, 1, 1)

        # Position of each lane within its sample (0..nf-1), computed once.
        pos = lax.broadcasted_iota(jnp.int32, (1, L), 1) % nf

        def tap(k):
            # out[:, b*nf + n] = x[:, b*nf + (n - s)], zero where n-s is
            # outside [0, nf).  One XLU roll + one VPU select per tap; the
            # mask also kills any cross-sample / circular wrap from the roll.
            s = pad - k * dilation
            if s == 0:
                return x
            rolled = pltpu.roll(x, shift=s % L, axis=1)
            mask = (pos >= s) if s > 0 else (pos < nf + s)
            return jnp.where(mask, rolled, 0.0)

        # Stacked operand: row (k*mfd + c) holds tap k of channel c.
        xs = jnp.concatenate([tap(k) for k in range(ks)], axis=0)  # (ks*mfd, L)

        # Grouped dilated Conv1d over the whole batch tile: ONE MXU matmul
        # with contraction K = ks*mfd and N = b_tile*nf, plus bias.
        y = jnp.dot(w2, xs, preferred_element_type=jnp.float32) + bias

        # GroupNorm: per-(group, sample) stats over (cg, nf), vectorized.
        # Two-step reshape keeps each reshape in a well-supported form
        # (lane split with 128-minor, then leading-dim split).
        y4 = y.reshape(mfd, b_tile, nf).reshape(G, cg, b_tile, nf)
        s1 = jnp.sum(jnp.sum(y4, axis=3, keepdims=True), axis=1, keepdims=True)
        mean = s1 * inv_n                                  # (G,1,b_tile,1)
        d = y4 - mean
        s2 = jnp.sum(jnp.sum(d * d, axis=3, keepdims=True), axis=1, keepdims=True)
        var = s2 * inv_n                                   # biased variance
        scale = gamma * lax.rsqrt(var + eps)               # gamma folded in
        yn = d * scale + beta                              # (G,cg,b_tile,nf)

        # LeakyReLU (default negative_slope = 0.01).
        c = jnp.where(yn > 0, yn, neg_slope * yn)
        c2 = c.reshape(mfd, b_tile, nf).reshape(mfd, L)

        # Residual: x + r + c with r = x.clone()  =>  2*x + c.
        o_ref[...] = (2.0 * x + c2).astype(o_ref.dtype)

    return kernel


def _num_tensorcores():
    # v7x has 2 TensorCores per chip; v5e/v6e have 1.  Best-effort query;
    # falls back to 1 (single big grid step) if nothing is exposed.
    try:
        info = pltpu.get_tpu_info()
        for attr in ("num_cores", "tensorcore_count", "core_count"):
            v = getattr(info, attr, None)
            if v:
                return int(v)
    except Exception:
        pass
    try:
        d = jax.devices()[0]
        for attr in ("num_cores", "core_count"):
            v = getattr(d, attr, None)
            if v:
                return int(v)
    except Exception:
        pass
    return 1


def _vmem_budget_bytes():
    # Half of physical VMEM as a working budget (keeps headroom for the
    # compiler's internal scratch / double-buffering on v7x's 64 MiB).
    try:
        return int(pltpu.get_tpu_info().vmem_capacity_bytes) // 2
    except Exception:
        return 16 * 1024 * 1024


def _pick_b_tile(bs, mfd, nf, ks, n_tc, vmem_budget):
    def fits(t):
        blk = mfd * t * nf * 4                       # one (mfd, t*nf) f32 slab
        w2 = mfd * ks * mfd * 4
        # in + out (double-buffered) + stacked taps + conv/GN temps + weights.
        need = 4 * blk + (ks + 5) * blk + 2 * w2
        return need <= vmem_budget

    divisors = [t for t in range(1, bs + 1) if bs % t == 0 and fits(t)]
    if not divisors:
        divisors = [1]
    if n_tc > 1:
        # Multi-TensorCore chip (v7x): keep >= n_tc parallel grid steps.
        pref = [t for t in divisors if bs // t >= n_tc]
        if pref:
            return max(pref)
    # Single-TC chip: one big step minimizes per-step pipeline overhead.
    return max(divisors)


def rcblock_prepare(conv_w, conv_b, gamma, beta, *, num_groups):
    """Host-side weight packing, hoisted out of the per-call path.

    conv_w: (mfd, mfd//G, ks) PyTorch Conv1d grouped weight.
    Returns (w2, params) with w2: (mfd, ks*mfd), params: (mfd, 3).
    """
    mfd, cg, ks = conv_w.shape
    G = num_groups
    # Per-tap block-diagonal (mfd, mfd) matrices concatenated along K.
    # TODO(synk): at production mfd/num_groups, replace the block-diagonal
    # expansion with a per-group contraction to avoid wasting (G-1)/G MXU FLOPs
    # and VMEM for the resident weight block.
    wk = jnp.transpose(conv_w.astype(jnp.float32), (2, 0, 1)).reshape(ks, G, cg, cg)
    w_bd = jnp.einsum('kgij,gh->kgihj', wk,
                      jnp.eye(G, dtype=jnp.float32)).reshape(ks, mfd, mfd)
    w2 = jnp.transpose(w_bd, (1, 0, 2)).reshape(mfd, ks * mfd)
    params = jnp.stack([conv_b, gamma, beta], axis=1).astype(jnp.float32)
    return w2, params


def rcblock_pallas(x, w2, params, *, ks, dilation, num_groups, b_tile=None):
    """x: (bs, mfd, nf) f32.  Returns (bs, mfd, nf) f32."""
    bs, mfd, nf = x.shape
    # PyTorch's p = (ks-1)*d//2 only gives a length-preserving ('same') conv
    # when (ks-1)*d is even; otherwise the PyTorch module itself cannot add
    # x + c (shape mismatch), so we require the even case.
    assert (ks - 1) * dilation % 2 == 0, "requires (ks-1)*dilation even"

    if b_tile is None:
        b_tile = _pick_b_tile(bs, mfd, nf, ks, _num_tensorcores(),
                              _vmem_budget_bytes())
    if nf % 128 != 0 and b_tile != bs:
        b_tile = bs  # full-lane block sidesteps the (8,128) divisibility rule
    assert bs % b_tile == 0, "b_tile must divide the batch size"

    # Channels-major, lane-dense layout: (mfd, bs*nf).  Pure XLA plumbing.
    x2 = jnp.transpose(x, (1, 0, 2)).reshape(mfd, bs * nf).astype(jnp.float32)

    kernel = _make_kernel(ks, dilation, num_groups, mfd, nf, b_tile)

    # TODO(synk): at production shapes set vmem_limit_bytes explicitly (v7x has
    # only 64 MiB physical VMEM) and consider pipeline_mode=pl.Buffered(3) on
    # the x spec once the grid is long; optional bf16 I/O with f32 accumulation
    # is a further ~2x HBM saving if the model tolerates it.
    out2 = pl.pallas_call(
        kernel,
        out_shape=jax.ShapeDtypeStruct((mfd, bs * nf), jnp.float32),
        grid=(bs // b_tile,),
        in_specs=[
            pl.BlockSpec((mfd, b_tile * nf), lambda i: (0, i)),
            pl.BlockSpec((mfd, ks * mfd), lambda i: (0, 0)),
            pl.BlockSpec((mfd, 3), lambda i: (0, 0)),
        ],
        out_specs=pl.BlockSpec((mfd, b_tile * nf), lambda i: (0, i)),
        compiler_params=pltpu.CompilerParams(
            dimension_semantics=("parallel",)),
    )(x2, w2, params)

    return jnp.transpose(out2.reshape(mfd, bs, nf), (1, 0, 2))


def rcblock_reference(x, conv_w, conv_b, gamma, beta, *, ks, dilation, num_groups):
    """Pure-JAX reference matching the PyTorch forward."""
    pad = (ks - 1) * dilation // 2
    y = lax.conv_general_dilated(
        x, conv_w, window_strides=(1,), padding=[(pad, pad)],
        rhs_dilation=(dilation,), dimension_numbers=("NCH", "OIH", "NCH"),
        feature_group_count=num_groups) + conv_b[None, :, None]
    bs, C, L = y.shape
    yg = y.reshape(bs, num_groups, C // num_groups, L)
    mean = yg.mean(axis=(2, 3), keepdims=True)
    var = yg.var(axis=(2, 3), keepdims=True)
    yn = ((yg - mean) / jnp.sqrt(var + 1e-5)).reshape(bs, C, L)
    yn = yn * gamma[None, :, None] + beta[None, :, None]
    c = jnp.where(yn > 0, yn, 0.01 * yn)
    return 2.0 * x + c


if __name__ == "__main__":
    # Module hyperparameters
    output_dim = 32     # mfd (channels)
    ks = 3
    dilation = 2
    num_groups = 2

    # Small input consistent with forward(): x of shape (bs, mfd, nf).
    bs, mfd, nf = 4, output_dim, 128

    key = jax.random.PRNGKey(0)
    kx, kw, kb, kg, kbt = jax.random.split(key, 5)

    x = jax.random.normal(kx, (bs, mfd, nf), jnp.float32)
    # Conv1d(mfd, mfd, ks, groups=num_groups) weight: (mfd, mfd//G, ks)
    fan_in = (mfd // num_groups) * ks
    bound = 1.0 / jnp.sqrt(fan_in)
    conv_w = jax.random.uniform(kw, (mfd, mfd // num_groups, ks),
                                jnp.float32, -bound, bound)
    conv_b = jax.random.uniform(kb, (mfd,), jnp.float32, -bound, bound)
    # GroupNorm affine params (deterministic, slightly perturbed from defaults)
    gamma = 1.0 + 0.1 * jax.random.normal(kg, (mfd,), jnp.float32)
    beta = 0.1 * jax.random.normal(kbt, (mfd,), jnp.float32)

    # Weight packing done once (module-init time), not per forward call.
    w2, params = rcblock_prepare(conv_w, conv_b, gamma, beta,
                                 num_groups=num_groups)

    run = functools.partial(rcblock_pallas, ks=ks, dilation=dilation,
                            num_groups=num_groups)
    out = jax.block_until_ready(run(x, w2, params))

    ref = rcblock_reference(x, conv_w, conv_b, gamma, beta,
                            ks=ks, dilation=dilation, num_groups=num_groups)
    assert out.shape == (bs, mfd, nf)
    assert jnp.allclose(out, ref, rtol=1e-4, atol=1e-4), "mismatch vs reference"

    print("KERNEL_OK")
</pallas_src>

<mosaic_0001>
module attributes {stable_mosaic.version = 11 : i64} {
  func.func @kernel(%arg0: i32, %arg1: memref<32x512xf32, #tpu.memory_space<vmem>>, %arg2: memref<32x96xf32, #tpu.memory_space<vmem>>, %arg3: memref<32x3xf32, #tpu.memory_space<vmem>>, %arg4: memref<32x512xf32, #tpu.memory_space<vmem>>) attributes {dimension_semantics = [#tpu.dimension_semantics<parallel>], iteration_bounds = array<i64: 1>, scalar_prefetch = 0 : i64, scratch_operands = 0 : i64, tpu.core_type = #tpu.core_type<tc>, window_params = [{transform_indices = @transform_0, window_bounds = array<i64: 32, 512>}, {pipeline_mode = #tpu.pipeline_mode<synchronous>, transform_indices = @transform_1, window_bounds = array<i64: 32, 96>}, {pipeline_mode = #tpu.pipeline_mode<synchronous>, transform_indices = @transform_2, window_bounds = array<i64: 32, 3>}, {transform_indices = @transform_3, window_bounds = array<i64: 32, 512>}]} {
    %c0 = arith.constant 0 : index
    %c0_0 = arith.constant 0 : index
    %0 = vector.load %arg1[%c0, %c0_0] : memref<32x512xf32, #tpu.memory_space<vmem>>, vector<32x512xf32>
    %c0_1 = arith.constant 0 : index
    %c0_2 = arith.constant 0 : index
    %1 = vector.load %arg2[%c0_1, %c0_2] : memref<32x96xf32, #tpu.memory_space<vmem>>, vector<32x96xf32>
    %c0_3 = arith.constant 0 : index
    %c0_4 = arith.constant 0 : index
    %2 = vector.load %arg3[%c0_3, %c0_4] : memref<32x3xf32, #tpu.memory_space<vmem>>, vector<32x1xf32>
    %c0_5 = arith.constant 0 : index
    %c1 = arith.constant 1 : index
    %3 = vector.load %arg3[%c0_5, %c1] : memref<32x3xf32, #tpu.memory_space<vmem>>, vector<32x1xf32>
    %4 = vector.shape_cast %3 : vector<32x1xf32> to vector<2x16x1x1xf32>
    %c0_6 = arith.constant 0 : index
    %c2 = arith.constant 2 : index
    %5 = vector.load %arg3[%c0_6, %c2] : memref<32x3xf32, #tpu.memory_space<vmem>>, vector<32x1xf32>
    %6 = vector.shape_cast %5 : vector<32x1xf32> to vector<2x16x1x1xf32>
    %7 = tpu.iota {dimensions = array<i32: 1>} : vector<1x512xi32>
    %c128_i32 = arith.constant 128 : i32
    %c0_i32 = arith.constant 0 : i32
    %8 = arith.cmpi eq, %c128_i32, %c0_i32 : i32
    %c1_i32 = arith.constant 1 : i32
    %9 = arith.select %8, %c1_i32, %c128_i32 : i32
    %10 = vector.broadcast %9 : i32 to vector<1x512xi32>
    %11 = arith.remsi %7, %10 : vector<1x512xi32>
    %c0_i32_7 = arith.constant 0 : i32
    %12 = vector.broadcast %c0_i32_7 : i32 to vector<1x512xi32>
    %13 = arith.cmpi ne, %11, %12 : vector<1x512xi32>
    %c0_i32_8 = arith.constant 0 : i32
    %14 = vector.broadcast %c0_i32_8 : i32 to vector<1x512xi32>
    %15 = arith.cmpi slt, %11, %14 : vector<1x512xi32>
    %c0_i32_9 = arith.constant 0 : i32
    %16 = arith.cmpi slt, %9, %c0_i32_9 : i32
    %17 = vector.broadcast %16 : i1 to vector<1x512xi1>
    %18 = vector.broadcast %17 : vector<1x512xi1> to vector<1x512xi1>
    %19 = arith.xori %15, %18 : vector<1x512xi1>
    %20 = arith.andi %19, %13 : vector<1x512xi1>
    %21 = vector.broadcast %9 : i32 to vector<1x512xi32>
    %22 = arith.addi %11, %21 : vector<1x512xi32>
    %23 = arith.select %20, %22, %11 : vector<1x512xi1>, vector<1x512xi32>
    %c2_i32 = arith.constant 2 : i32
    %24 = tpu.dynamic_rotate %0 by %c2_i32 dim 1 : vector<32x512xf32>, i32 -> vector<32x512xf32>
    %c2_i32_10 = arith.constant 2 : i32
    %25 = vector.broadcast %c2_i32_10 : i32 to vector<1x512xi32>
    %26 = arith.cmpi sge, %23, %25 : vector<1x512xi32>
    %cst = arith.constant 0.000000e+00 : f32
    %27 = vector.shape_cast %26 : vector<1x512xi1> to vector<1x512xi1>
    %28 = vector.broadcast %27 : vector<1x512xi1> to vector<32x512xi1>
    %29 = vector.broadcast %cst : f32 to vector<32x512xf32>
    %30 = arith.select %28, %24, %29 : vector<32x512xi1>, vector<32x512xf32>
    %c510_i32 = arith.constant 510 : i32
    %31 = tpu.dynamic_rotate %0 by %c510_i32 dim 1 : vector<32x512xf32>, i32 -> vector<32x512xf32>
    %c126_i32 = arith.constant 126 : i32
    %32 = vector.broadcast %c126_i32 : i32 to vector<1x512xi32>
    %33 = arith.cmpi slt, %23, %32 : vector<1x512xi32>
    %cst_11 = arith.constant 0.000000e+00 : f32
    %34 = vector.shape_cast %33 : vector<1x512xi1> to vector<1x512xi1>
    %35 = vector.broadcast %34 : vector<1x512xi1> to vector<32x512xi1>
    %36 = vector.broadcast %cst_11 : f32 to vector<32x512xf32>
    %37 = arith.select %35, %31, %36 : vector<32x512xi1>, vector<32x512xf32>
    %38 = tpu.concatenate %30, %0, %37 in 0 : vector<32x512xf32>, vector<32x512xf32>, vector<32x512xf32> -> vector<96x512xf32>
    %cst_12 = arith.constant dense<0.000000e+00> : vector<32x512xf32>
    %39 = tpu.matmul %1, %38, %cst_12 {dimension_numbers = #tpu.dot_dimension_numbers<[1], [0], [0], [1], [0, 0, 1, 1], [], []>} : vector<32x96xf32>, vector<96x512xf32>, vector<32x512xf32> -> vector<32x512xf32>
    %40 = vector.broadcast %2 : vector<32x1xf32> to vector<32x512xf32>
    %41 = arith.addf %39, %40 : vector<32x512xf32>
    %42 = vector.shape_cast %41 : vector<32x512xf32> to vector<32x4x128xf32>
    %43 = vector.shape_cast %42 : vector<32x4x128xf32> to vector<2x16x4x128xf32>
    %cst_13 = arith.constant dense<0.000000e+00> : vector<2x16x4xf32>
    %44 = vector.multi_reduction <add>, %43, %cst_13 [3] : vector<2x16x4x128xf32> to vector<2x16x4xf32>
    %45 = vector.shape_cast %44 : vector<2x16x4xf32> to vector<2x16x4x1xf32>
    %cst_14 = arith.constant dense<0.000000e+00> : vector<2x4x1xf32>
    %46 = vector.multi_reduction <add>, %45, %cst_14 [1] : vector<2x16x4x1xf32> to vector<2x4x1xf32>
    %47 = vector.shape_cast %46 : vector<2x4x1xf32> to vector<2x1x4x1xf32>
    %cst_15 = arith.constant 4.8828125E-4 : f32
    %48 = vector.broadcast %cst_15 : f32 to vector<2x1x4x1xf32>
    %49 = arith.mulf %47, %48 : vector<2x1x4x1xf32>
    %50 = vector.broadcast %49 : vector<2x1x4x1xf32> to vector<2x16x4x128xf32>
    %51 = arith.subf %43, %50 : vector<2x16x4x128xf32>
    %52 = arith.mulf %51, %51 : vector<2x16x4x128xf32>
    %cst_16 = arith.constant dense<0.000000e+00> : vector<2x16x4xf32>
    %53 = vector.multi_reduction <add>, %52, %cst_16 [3] : vector<2x16x4x128xf32> to vector<2x16x4xf32>
    %54 = vector.shape_cast %53 : vector<2x16x4xf32> to vector<2x16x4x1xf32>
    %cst_17 = arith.constant dense<0.000000e+00> : vector<2x4x1xf32>
    %55 = vector.multi_reduction <add>, %54, %cst_17 [1] : vector<2x16x4x1xf32> to vector<2x4x1xf32>
    %56 = vector.shape_cast %55 : vector<2x4x1xf32> to vector<2x1x4x1xf32>
    %cst_18 = arith.constant 4.8828125E-4 : f32
    %57 = vector.broadcast %cst_18 : f32 to vector<2x1x4x1xf32>
    %58 = arith.mulf %56, %57 : vector<2x1x4x1xf32>
    %cst_19 = arith.constant 9.99999974E-6 : f32
    %59 = vector.broadcast %cst_19 : f32 to vector<2x1x4x1xf32>
    %60 = arith.addf %58, %59 : vector<2x1x4x1xf32>
    %61 = math.rsqrt %60 : vector<2x1x4x1xf32>
    %62 = vector.broadcast %4 : vector<2x16x1x1xf32> to vector<2x16x4x1xf32>
    %63 = vector.broadcast %61 : vector<2x1x4x1xf32> to vector<2x16x4x1xf32>
    %64 = arith.mulf %62, %63 : vector<2x16x4x1xf32>
    %65 = vector.broadcast %64 : vector<2x16x4x1xf32> to vector<2x16x4x128xf32>
    %66 = arith.mulf %51, %65 : vector<2x16x4x128xf32>
    %67 = vector.broadcast %6 : vector<2x16x1x1xf32> to vector<2x16x4x128xf32>
    %68 = arith.addf %66, %67 : vector<2x16x4x128xf32>
    %cst_20 = arith.constant 0.000000e+00 : f32
    %69 = vector.broadcast %cst_20 : f32 to vector<2x16x4x128xf32>
    %70 = arith.cmpf ogt, %68, %69 : vector<2x16x4x128xf32>
    %cst_21 = arith.constant 0.00999999977 : f32
    %71 = vector.broadcast %cst_21 : f32 to vector<2x16x4x128xf32>
    %72 = arith.mulf %71, %68 : vector<2x16x4x128xf32>
    %73 = arith.select %70, %68, %72 : vector<2x16x4x128xi1>, vector<2x16x4x128xf32>
    %74 = vector.shape_cast %73 : vector<2x16x4x128xf32> to vector<32x4x128xf32>
    %75 = vector.shape_cast %74 : vector<32x4x128xf32> to vector<32x512xf32>
    %cst_22 = arith.constant 2.000000e+00 : f32
    %76 = vector.broadcast %cst_22 : f32 to vector<32x512xf32>
    %77 = arith.mulf %76, %0 : vector<32x512xf32>
    %78 = arith.addf %77, %75 : vector<32x512xf32>
    %c0_23 = arith.constant 0 : index
    %c0_24 = arith.constant 0 : index
    %79 = vector.load %arg4[%c0_23, %c0_24] : memref<32x512xf32, #tpu.memory_space<vmem>>, vector<32x512xf32>
    tpu.vector_store %arg4[%c0_23, %c0_24], %78 {strides = array<i32>} : memref<32x512xf32, #tpu.memory_space<vmem>>, vector<32x512xf32>,
    return
  }
  func.func @transform_0(%arg0: i32) -> (i32, i32) {
    %c0_i32 = arith.constant 0 : i32
    %c0_i32_0 = arith.constant 0 : i32
    return %c0_i32, %arg0 : i32, i32
  }
  func.func @transform_1(%arg0: i32) -> (i32, i32) {
    %c0_i32 = arith.constant 0 : i32
    %c0_i32_0 = arith.constant 0 : i32
    %c0_i32_1 = arith.constant 0 : i32
    return %c0_i32, %c0_i32_0 : i32, i32
  }
  func.func @transform_2(%arg0: i32) -> (i32, i32) {
    %c0_i32 = arith.constant 0 : i32
    %c0_i32_0 = arith.constant 0 : i32
    %c0_i32_1 = arith.constant 0 : i32
    return %c0_i32, %c0_i32_0 : i32, i32
  }
  func.func @transform_3(%arg0: i32) -> (i32, i32) {
    %c0_i32 = arith.constant 0 : i32
    %c0_i32_0 = arith.constant 0 : i32
    return %c0_i32, %arg0 : i32, i32
  }
}

</mosaic_0001>

<bundles_post_ra>
// kernel: tpu_custom_call.1
= control target key start
LH: loop header
LB: loop body
LE: loop exit
PB: predicated region body
PF: predicated region fallthrough
CT: control target
= control target key end

     0   :  { %8 = vsyncpa [#allocation3], 0  ;;  %s3450_s0 = inlined_call_operand.hbm [shape: f32[32,512], index: 0, kind: input, shape index: {}]   ;;  %s3451_s1 = inlined_call_operand.vmem [shape: f32[32,96], index: 1, kind: input, shape index: {}]   ;;  %s3452_s2 = inlined_call_operand.vmem [shape: f32[32,3], index: 2, kind: input, shape index: {}]   ;;  %s3453_s3 = inlined_call_operand.hbm [shape: f32[32,512], index: 3, kind: output, shape index: {}]  }
   0x1   :  { %9 = vsyncpa [#allocation4], 0  ;;  %s14_s14 = sshll.u32 %s3450_s0, 4  ;;  %s2050_s15 = smov [#allocation2]   ;;  %s15_s14 = int_to_ptr.hbm [resolvable:$true] %s14_s14 }
   0x2   :  { %s16_s16 = sshll.u32 %s2050_s15, 4  ;;  %s2051_s17 = smov 512   ;;  %s17_s16 = int_to_ptr.vmem [resolvable:$true] %s16_s16 }
   0x3   :  { %s2052_s18 = smov 32  }
   0x4   :  { %22 = dma.hbm_to_vmem [thread:$0]  %s15_s14, 2048, %s17_s16, [#allocation3], %s2051_s17, %s2051_s17, %s2052_s18  }
   0x5   :  { %2046 = dma.done.wait [#allocation3], 2048  }
   0x6   :  { %2047 = vsyncadd [#allocation3], 4294965248  ;;  %v2087_v0 = vld [vmem:[#allocation2 + $0x40] sm:$0xff]  ;;  %v2089_v1 = vld [vmem:[#allocation2 + $0x8] sm:$0xff]  ;;  %s2053_s19 = smov 2   ;;  %s2054_s0 = smov 126   ;;  %v87_v45 = vlaneseq }
   0x7   :  { %v2091_v2 = vld [vmem:[#allocation2] sm:$0xff]  ;;  %144 = vrot.lane.b32.xlu1 %v2087_v0, %s2053_s19  ;;  %148 = vrot.lane.b32.xlu2 %v2089_v1, %s2053_s19  ;;  %v2101_v4 = vld [vmem:[#allocation2 + $0x28] sm:$0xff]  ;;  %v2113_v7 = vld [vmem:[#allocation2 + $0x10] sm:$0xff]  ;;  %v2055_v24 = vmov 0   ;;  %v3454_v37 = vmov 2   ;;  %vm310_vm4 = vcmask 785408  }
   0x8   :  { %140 = vrot.lane.b32.xlu0 %v2091_v2, %s2053_s19  ;;  %v2099_v3 = vld [vmem:[#allocation2 + $0x60] sm:$0xff]  ;;  %v2111_v6 = vld [vmem:[#allocation2 + $0x68] sm:$0xff]  ;;  %v2123_v9 = vld [vmem:[#allocation2 + $0x50] sm:$0xff]  ;;  %1965 = vset.pattern.permute.xlu2 %v2055_v24  ;;  %v2245_v49 = vand.u32 127, %v87_v45  ;;  %vm440_vm10 = vcmask 1047556   ;;  %vm664_vm11 = vcmask 1043456  }
   0x9   :  { %v2103_v5 = vld [vmem:[#allocation2 + $0x20] sm:$0xff]  ;;  %v2115_v8 = vld [vmem:[#allocation2 + $0x48] sm:$0xff]  ;;  %v2125_v10 = vld [vmem:[#allocation2 + $0x70] sm:$0xff]  ;;  %1967 = vset.pattern.permute.xlu1 %v2055_v24  ;;  %1966 = vset.pattern.permute.xlu0 %v2055_v24  ;;  %s1893_s13 = sshll.u32 %s3453_s3, 4  ;;  %s1894_s13 = int_to_ptr.hbm [resolvable:$true] %s1893_s13 }
   0xa   :  { %v2127_v11 = vld [vmem:[#allocation2 + $0x30] sm:$0xff]  ;;  %v2135_v12 = vld [vmem:[#allocation2 + $0x38] sm:$0xff]  ;;  %v2190_v27 = vld [vmem:[%s3452_s2] sm:$0xff]  ;;  %vm249_vm0 = vcmp.lt.s32.totalorder %v2245_v49, 126  ;;  %vm189_vm1 = vcmp.ge.s32.totalorder %v2245_v49, 2  ;;  %vm172_vm2 = vcmp.lt.s32.totalorder %v2245_v49, 2 }
   0xb   :  { %v2137_v13 = vld [vmem:[#allocation2 + $0x58] sm:$0xff]  ;;  %v2208_v32 = vld [vmem:[%s3452_s2 + $0x10] sm:$0xff]  ;;  %v3457_v36 = vperm.slane %v2190_v27, 0  ;;  %v60_v38 = vrot.slane %v2190_v27, 2  ;;  %v61_v41 = vrot.slane %v2190_v27, 3  ;;  %v62_v46 = vrot.slane %v2190_v27, 4 }
   0xc   :  { %v2139_v14 = vld [vmem:[#allocation2 + $0x18] sm:$0xff]  ;;  %3486 = vst [vmem:[#allocation9_spill] sm:$0xff] %v2208_v32  ;;  %v2240_v47 = vld [vmem:[%s3452_s2 + $0x8] sm:$0xff]  ;;  %v63_v50 = vrot.slane %v2190_v27, 5  ;;  %v65_v56 = vrot.slane %v2190_v27, 7  ;;  %v59_v57 = vrot.slane %v2190_v27, 1 }
   0xd   :  { %v2147_v15 = vld [vmem:[#allocation2 + $0x78] sm:$0xff]  ;;  %v2223_v39 = vperm.slane %v60_v38, 0  ;;  %v2233_v44 = vperm.slane %v61_v41, 0  ;;  %v2243_v48 = vperm.slane %v62_v46, 0  ;;  %v3456_v63 = vperm.slane %v2240_v47, 0 }
   0xe   :  { %v2202_v31 = vld [vmem:[%s3452_s2 + $0x18] sm:$0xff]  ;;  %v2260_v55 = vperm.slane %v63_v50, 0  ;;  %v2268_v58 = vperm.slane %v65_v56, 0  ;;  %v2270_v59 = vperm.slane %v59_v57, 0  ;;  %v67_v24 = vrot.slane %v2240_v47, 2 }
   0xf   :  { %146 = vrot.lane.b32.xlu1 %v2099_v3, %s2053_s19  ;;  %150 = vrot.lane.b32.xlu2 %v2101_v4, %s2053_s19  ;;  %3485 = vst [vmem:[#allocation8_spill] sm:$0xff] %v2202_v31  ;;  %v64_v38 = vrot.slane %v2190_v27, 6  ;;  %v2309_v57 = vadd.s32 128, %v2245_v49 }
  0x10   :  { %142 = vrot.lane.b32.xlu0 %v2103_v5, %s2053_s19  ;;  %3487 = vst [vmem:[#allocation10_spill] sm:$0xff] %v2260_v55  ;;  %v2292_v45 = vperm.slane %v67_v24, 0 }
  0x11   :  { %3488 = vst [vmem:[#allocation11_spill] sm:$0xff] %v2268_v58  ;;  %v2294_v46 = vperm.slane %v64_v38, 0  ;;  %v70_v38 = vrot.slane %v2240_v47, 5 }
  0x12   :  { %3489 = vst [vmem:[#allocation12_spill] sm:$0xff] %v2292_v45 }
  0x13   :  { %3490 = vst [vmem:[#allocation13_spill] sm:$0xff] %v2294_v46 }
  0x17   :  { %154 = vrot.lane.b32.xlu1 %v2111_v6, %s2053_s19  ;;  %156 = vrot.lane.b32.xlu2 %v2113_v7, %s2053_s19 }
  0x18   :  { %152 = vrot.lane.b32.xlu0 %v2115_v8, %s2053_s19 }
  0x1f   :  { %160 = vrot.lane.b32.xlu1 %v2123_v9, %s2053_s19  ;;  %162 = vrot.lane.b32.xlu2 %v2125_v10, %s2053_s19 }
  0x20   :  { %158 = vrot.lane.b32.xlu0 %v2127_v11, %s2053_s19 }
  0x27   :  { %166 = vrot.lane.b32.xlu1 %v2135_v12, %s2053_s19  ;;  %168 = vrot.lane.b32.xlu2 %v2137_v13, %s2053_s19 }
  0x28   :  { %164 = vrot.lane.b32.xlu0 %v2139_v14, %s2053_s19 }
  0x2f   :  { %217 = vrot.lane.b32.xlu1 %v2091_v2, %s2054_s0  ;;  %219 = vrot.lane.b32.xlu2 %v2103_v5, %s2054_s0 }
  0x30   :  { %170 = vrot.lane.b32.xlu0 %v2147_v15, %s2053_s19 }
  0x37   :  { %223 = vrot.lane.b32.xlu1 %v2099_v3, %s2054_s0  ;;  %225 = vrot.lane.b32.xlu2 %v2089_v1, %s2054_s0 }
  0x38   :  { %221 = vrot.lane.b32.xlu0 %v2087_v0, %s2054_s0 }
  0x3f   :  { %229 = vrot.lane.b32.xlu1 %v2115_v8, %s2054_s0  ;;  %231 = vrot.lane.b32.xlu2 %v2111_v6, %s2054_s0 }
  0x40   :  { %227 = vrot.lane.b32.xlu0 %v2101_v4, %s2054_s0 }
  0x47   :  { %235 = vrot.lane.b32.xlu1 %v2127_v11, %s2054_s0  ;;  %237 = vrot.lane.b32.xlu2 %v2123_v9, %s2054_s0 }
  0x48   :  { %233 = vrot.lane.b32.xlu0 %v2113_v7, %s2054_s0 }
  0x4f   :  { %241 = vrot.lane.b32.xlu1 %v2139_v14, %s2054_s0  ;;  %243 = vrot.lane.b32.xlu2 %v2135_v12, %s2054_s0 }
  0x50   :  { %239 = vrot.lane.b32.xlu0 %v2125_v10, %s2054_s0 }
  0x57   :  { %247 = vrot.lane.b32.xlu1 %v2147_v15, %s2054_s0  ;;  %295 = vperm.xlu2 %1965, %v2190_v27  }
  0x58   :  { %245 = vrot.lane.b32.xlu0 %v2137_v13, %s2054_s0 }
  0x5f   :  { %307 = vperm.xlu2 %1965, %v2202_v31   ;;  %303 = vperm.xlu1 %1967, %v2208_v32  }
  0x60   :  { %299 = vperm.xlu0 %1966, %v2240_v47  }
  0x61   :  { %v2167_v16 = vpop.permute.xlu2 %148 }
  0x67   :  { %1968 = vset.pattern.permute.xlu2 %v3454_v37  ;;  %1970 = vset.pattern.permute.xlu1 %v3454_v37 }
  0x68   :  { %1360 = vperm.xlu2 %1968, %v3457_v36   ;;  %1368 = vperm.xlu1 %1970, %v2223_v39  }
  0x69   :  { %v2169_v17 = vpop.permute.xlu2 %150  ;;  %1969 = vset.pattern.permute.xlu0 %v3454_v37 }
  0x6a   :  { %1364 = vperm.xlu0 %1969, %v2270_v59  }
  0x70   :  { %1372 = vperm.xlu2 %1968, %v2233_v44   ;;  %1376 = vperm.xlu1 %1970, %v2243_v48  }
  0x71   :  { %v2171_v18 = vpop.permute.xlu2 %156 }
  0x72   :  { %1384 = vperm.xlu0 %1969, %v2294_v46  }
  0x78   :  { %1380 = vperm.xlu2 %1968, %v2260_v55   ;;  %1388 = vperm.xlu1 %1970, %v2268_v58  }
  0x79   :  { %v2173_v19 = vpop.permute.xlu1 %144  ;;  %v2181_v23 = vpop.permute.xlu2 %162 }
  0x7a   :  { %v2175_v20 = vpop.permute.xlu0 %140 }
  0x80   :  { %1392 = vperm.xlu2 %1968, %v3456_v63   ;;  %1400 = vperm.xlu1 %1970, %v2292_v45   ;;  %v72_v63 = vrot.slane %v2240_v47, 7 }
  0x81   :  { %v2177_v21 = vpop.permute.xlu1 %146  ;;  %v2193_v28 = vpop.permute.xlu2 %168 }
  0x82   :  { %v2179_v22 = vpop.permute.xlu0 %142 }
  0x89   :  { %v2183_v25 = vpop.permute.xlu1 %154  ;;  %v2211_v33 = vpop.permute.xlu2 %219 }
  0x8a   :  { %v2185_v26 = vpop.permute.xlu0 %152 }
  0x91   :  { %v2195_v29 = vpop.permute.xlu1 %160  ;;  %v2225_v40 = vpop.permute.xlu2 %225 }
  0x92   :  { %v2197_v30 = vpop.permute.xlu0 %158 }
  0x99   :  { %v2213_v34 = vpop.permute.xlu1 %166  ;;  %v2249_v51 = vpop.permute.xlu2 %231 }
  0x9a   :  { %v2215_v35 = vpop.permute.xlu0 %164 }
  0xa1   :  { %v2229_v42 = vpop.permute.xlu1 %217 }
  0xa2   :  { %v2231_v43 = vpop.permute.xlu0 %170  ;;  %v258_v50 = vsel %vm249_vm0, %v2229_v42, %v2225_v40 }
  0xa9   :  { %v2251_v52 = vpop.permute.xlu1 %223 }
  0xaa   :  { %v2254_v53 = vpop.permute.xlu0 %221  ;;  %v261_v54 = vsel %vm249_vm0, %v2251_v52, %v2249_v51 }
  0xab   :  { %1906 = vmatpush.msk.msra.mxu0 %vm249_vm0, %v261_v54  ;;  %v68_v54 = vrot.slane %v2240_v47, 3 }
  0xad   :  { %v2313_v24 = vperm.slane %v68_v54, 0  ;;  %v2337_v54 = vadd.s32 384, %v2245_v49 }
  0xaf   :  { %3491 = vst [vmem:[#allocation14_spill] sm:$0xff] %v2313_v24  ;;  %1404 = vperm.xlu2 %1968, %v2313_v24   ;;  %v69_v24 = vrot.slane %v2240_v47, 4 }
  0xb1   :  { %v230_v60 = vpop.permute.xlu1 %229 }
  0xb2   :  { %v2274_v61 = vpop.permute.xlu0 %227  ;;  %v260_v62 = vsel %vm249_vm0, %v2254_v53, %v230_v60 }
  0xb3   :  { %1907 = vmatpush.msk.msra.mxu0 %vm249_vm0, %v260_v62  ;;  %v259_v41 = vsel %vm249_vm0, %v2211_v33, %v2274_v61 }
  0xb5   :  { %1908 = vmatpush.msk.msra.mxu0 %vm249_vm0, %v259_v41  ;;  %v66_v41 = vrot.slane %v2240_v47, 1 }
  0xb7   :  { %1909 = vmatpush.msk.msra.mxu0 %vm249_vm0, %v258_v50  ;;  %v3460_v50 = vand.u32 127, %v2309_v57  ;;  %v2324_v37 = vperm.slane %v66_v41, 0 }
  0xb9   :  { %v2305_v56 = vpop.permute.xlu1 %235  ;;  %331 = vmatpush.msra.mxu0 %v2099_v3  ;;  %v2321_v3 = vperm.slane %v70_v38, 0  ;;  %1396 = vperm.xlu0 %1969, %v2324_v37   ;;  %v71_v38 = vrot.slane %v2240_v47, 6  ;;  %vm2345_vm3 = vcmp.lt.s32.totalorder %v3460_v50, 126  ;;  %v2380_v50 = vperm.slane %v69_v24, 0 }
  0xba   :  { %v2311_v62 = vpop.permute.xlu0 %233  ;;  %v180_v24 = vsel %vm172_vm2, %v2183_v25, %v2181_v23 }
  0xbb   :  { %332 = vmatpush.msra.mxu0 %v2087_v0  ;;  %3492 = vst [vmem:[#allocation15_spill] sm:$0xff] %v2321_v3  ;;  %1412 = vperm.xlu1 %1970, %v2321_v3   ;;  %v188_v0 = vsel %vm172_vm2, %v2231_v43, %v2177_v21  ;;  %v187_v3 = vsel %vm172_vm2, %v2193_v28, %v2173_v19  ;;  %v2353_v45 = vperm.slane %v71_v38, 0 }
  0xbc   :  { %v186_v38 = vsel %vm172_vm2, %v2213_v34, %v2179_v22 }
  0xbd   :  { %333 = vmatpush.msra.mxu0 %v2103_v5  ;;  %v2334_v5 = vadd.s32 256, %v2245_v49  ;;  %3495 = vst [vmem:[#allocation16_spill] sm:$0xff] %v2353_v45  ;;  %1416 = vperm.xlu2 %1968, %v2353_v45   ;;  %v86_v49 = vrot.slane %v2202_v31, 7 }
  0xbf   :  { %334 = vmatpush.msra.mxu0 %v2091_v2  ;;  %v238_v2 = vpop.permute.xlu2 %237  ;;  %v3463_v58 = vand.u32 127, %v2334_v5 }
  0xc1   :  { %v242_v41 = vpop.permute.xlu1 %241  ;;  %1910 = vmatpush.msk.msra.mxu0 %vm189_vm1, %v188_v0  ;;  %vm2402_vm5 = vcmp.lt.s32.totalorder %v3463_v58, 126  ;;  %1408 = vperm.xlu0 %1969, %v2380_v50  }
  0xc2   :  { %v240_v36 = vpop.permute.xlu0 %239 }
  0xc3   :  { %1911 = vmatpush.msk.msra.mxu0 %vm189_vm1, %v187_v3  ;;  %v257_v0 = vsel %vm249_vm0, %v2249_v51, %v240_v36  ;;  %v256_v51 = vsel %vm249_vm0, %v230_v60, %v238_v2  ;;  %v185_v3 = vsel %vm172_vm2, %v2215_v35, %v2175_v20  ;;  %v255_v60 = vsel %vm249_vm0, %v2274_v61, %v2305_v56 }
  0xc4   :  { %1918 = vmatpush.msk.msra.mxu1 %vm2345_vm3, %v257_v0  ;;  %v2378_v0 = vld [vmem:[%s3451_s1] sm:$0xff]  ;;  %v73_v61 = vrot.slane %v2208_v32, 1 }
  0xc5   :  { %1912 = vmatpush.msk.msra.mxu0 %vm189_vm1, %v186_v38  ;;  %v3496_v38 = vperm.slane %v2208_v32, 0 }
  0xc6   :  { %1919 = vmatpush.msk.msra.mxu1 %vm2345_vm3, %v256_v51  ;;  %v2425_v55 = vperm.slane %v73_v61, 0  ;;  %v85_v51 = vrot.slane %v2202_v31, 6 }
  0xc7   :  { %1913 = vmatpush.msk.msra.mxu0 %vm189_vm1, %v185_v3  ;;  %1424 = vperm.xlu1 %1970, %v3496_v38   ;;  %v3499_v3 = vand.u32 127, %v2337_v54  ;;  %v244_v46 = vpop.permute.xlu2 %243 }
  0xc8   :  { %1920 = vmatpush.msk.msra.mxu1 %vm2345_vm3, %v255_v60  ;;  %1914 = vmatmul.msk.f32.vlgmr.msra.gmra.mxu0 %vm310_vm4, %v2378_v0  ;;  %v254_v60 = vsel %vm249_vm0, %v2225_v40, %v2311_v62  ;;  %3502 = vst [vmem:[#allocation17_spill] sm:$0xff] %v2425_v55  ;;  %v75_v40 = vrot.slane %v2208_v32, 3 }
  0xc9   :  { %vm2408_vm6 = vcmp.lt.s32.totalorder %v3499_v3, 126  ;;  %v248_v38 = vpop.permute.xlu1 %247  ;;  %1428 = vperm.xlu2 %1968, %v2425_v55  }
  0xca   :  { %1921 = vmatpush.msk.msra.mxu1 %vm2345_vm3, %v254_v60  ;;  %v246_v58 = vpop.permute.xlu0 %245  ;;  %v253_v3 = vsel %vm249_vm0, %v240_v36, %v248_v38  ;;  %v265_v45 = vsel %vm249_vm0, %v248_v38, %v2251_v52 }
  0xcb   :  { %1930 = vmatpush.msk.msra.mxu2 %vm2402_vm5, %v253_v3  ;;  %1942 = vmatpush.msk.msra.mxu3 %vm2408_vm6, %v265_v45  ;;  %v252_v36 = vsel %vm249_vm0, %v238_v2, %v246_v58  ;;  %v264_v52 = vsel %vm249_vm0, %v246_v58, %v2254_v53  ;;  %v251_v53 = vsel %vm249_vm0, %v2305_v56, %v244_v46  ;;  %v2456_v45 = vperm.slane %v75_v40, 0 }
  0xcc   :  { %360 = vmatpush.msra.mxu1 %v2111_v6  ;;  %v2447_v6 = vld [vmem:[%s3451_s1 + $0x8] sm:$0xff]  ;;  %v263_v58 = vsel %vm249_vm0, %v244_v46, %v2211_v33  ;;  %v262_v33 = vsel %vm249_vm0, %v242_v41, %v2229_v42  ;;  %v2471_v46 = vperm.slane %v72_v63, 0  ;;  %v76_v56 = vrot.slane %v2208_v32, 4 }
  0xcd   :  { %1931 = vmatpush.msk.msra.mxu2 %vm2402_vm5, %v252_v36  ;;  %1943 = vmatpush.msk.msra.mxu3 %vm2408_vm6, %v264_v52  ;;  %3503 = vst [vmem:[#allocation18_spill] sm:$0xff] %v2456_v45  ;;  %v2057_v40 = vmov 1983009808  }
  0xce   :  { %361 = vmatpush.msra.mxu1 %v2115_v8  ;;  %v250_v8 = vsel %vm249_vm0, %v2311_v62, %v242_v41  ;;  %v2486_v42 = vperm.slane %v76_v56, 0  ;;  %v184_v62 = vsel %vm172_vm2, %v2177_v21, %v2183_v25  ;;  %1420 = vperm.xlu0 %1969, %v2471_v46   ;;  %v183_v41 = vsel %vm172_vm2, %v2173_v19, %v2185_v26 }
  0xcf   :  { %1932 = vmatpush.msk.msra.mxu2 %vm2402_vm5, %v251_v53  ;;  %1944 = vmatpush.msk.msra.mxu3 %vm2408_vm6, %v263_v58  ;;  %v182_v19 = vsel %vm172_vm2, %v2179_v22, %v2169_v17  ;;  %v79_v22 = vrot.slane %v2208_v32, 7  ;;  %v82_v25 = vrot.slane %v2202_v31, 3  ;;  %v296_v3 = vpop.permute.xlu2 %295  ;;  %v445_v36 = vunpack.c.l.s4 %v2057_v40 }
  0xd0   :  { %362 = vmatpush.msra.mxu1 %v2101_v4  ;;  %1915 = vmatmul.msk.f32.gmra.mxu0 %vm310_vm4, %v2447_v6  ;;  %v3504_v4 = vand.u32 127, %v2309_v57  ;;  %3507 = vst [vmem:[#allocation19_spill] sm:$0xff] %v2486_v42  ;;  %v78_v57 = vrot.slane %v2208_v32, 6  ;;  %v2058_v56 = vmov 1934713408  }
  0xd1   :  { %1933 = vmatpush.msk.msra.mxu2 %vm2402_vm5, %v250_v8  ;;  %1945 = vmatpush.msk.msra.mxu3 %vm2408_vm6, %v262_v33  ;;  %v2649_v53 = vunpack.c.0.s8 %v445_v36 }
  0xd2   :  { %vm2480_vm7 = vcmp.ge.s32.totalorder %v3504_v4, 2  ;;  %363 = vmatpush.msra.mxu1 %v2089_v1  ;;  %1436 = vperm.xlu1 %1970, %v2456_v45   ;;  %v74_v1 = vrot.slane %v2208_v32, 2  ;;  %v469_v4 = vunpack.c.l.s4 %v2058_v56  ;;  %v300_v2 = vpop.permute.xlu0 %299 }
  0xd3   :  { %389 = vmatpush.msra.mxu2 %v2125_v10  ;;  %418 = vmatpush.msra.mxu3 %v2147_v15  ;;  %v2508_v10 = vld [vmem:[%s3451_s1 + $0x10] sm:$0xff]  ;;  %v2513_v15 = vperm.slane %v78_v57, 0  ;;  %3522 = vst [vmem:[#allocation28_spill] sm:$0xff] %v2649_v53 }
  0xd4   :  { %1922 = vmatpush.msk.msra.mxu1 %vm2480_vm7, %v184_v62  ;;  %1440 = vperm.xlu2 %1968, %v2486_v42   ;;  %v2531_v21 = vperm.slane %v74_v1, 0 }
  0xd5   :  { %390 = vmatpush.msra.mxu2 %v2123_v9  ;;  %419 = vmatpush.msra.mxu3 %v2137_v13  ;;  %3508 = vst [vmem:[#allocation20_spill] sm:$0xff] %v2513_v15  ;;  %v3509_v9 = vand.u32 127, %v2334_v5 }
  0xd6   :  { %1923 = vmatpush.msk.msra.mxu1 %vm2480_vm7, %v183_v41  ;;  %3512 = vst [vmem:[#allocation21_spill] sm:$0xff] %v2531_v21  ;;  %1432 = vperm.xlu0 %1969, %v2531_v21  }
  0xd7   :  { %391 = vmatpush.msra.mxu2 %v2127_v11  ;;  %420 = vmatpush.msra.mxu3 %v2135_v12  ;;  %vm2527_vm8 = vcmp.ge.s32.totalorder %v3509_v9, 2  ;;  %v181_v11 = vsel %vm172_vm2, %v2175_v20, %v2167_v16  ;;  %v3513_v12 = vand.u32 127, %v2337_v54  ;;  %v2553_v20 = vperm.slane %v79_v22, 0 }
  0xd8   :  { %1924 = vmatpush.msk.msra.mxu1 %vm2480_vm7, %v182_v19  ;;  %1916 = vmatmul.msk.f32.gmra.mxu0 %vm310_vm4, %v2508_v10  ;;  %v77_v54 = vrot.slane %v2208_v32, 5 }
  0xd9   :  { %392 = vmatpush.msra.mxu2 %v2113_v7  ;;  %421 = vmatpush.msra.mxu3 %v2139_v14  ;;  %vm2542_vm9 = vcmp.ge.s32.totalorder %v3513_v12, 2  ;;  %3516 = vst [vmem:[#allocation22_spill] sm:$0xff] %v2553_v20  ;;  %v176_v7 = vsel %vm172_vm2, %v2181_v23, %v2231_v43  ;;  %v179_v14 = vsel %vm172_vm2, %v2185_v26, %v2195_v29  ;;  %v50_v43 = vld [vmem:[%s3451_s1 + $0x18] sm:$0xff] }
  0xda   :  { %1925 = vmatpush.msk.msra.mxu1 %vm2480_vm7, %v181_v11  ;;  %1448 = vperm.xlu1 %1970, %v2513_v15   ;;  %v175_v23 = vsel %vm172_vm2, %v2195_v29, %v2193_v28  ;;  %v178_v26 = vsel %vm172_vm2, %v2169_v17, %v2197_v30  ;;  %v174_v28 = vsel %vm172_vm2, %v2197_v30, %v2213_v34  ;;  %v2602_v29 = vperm.slane %v82_v25, 0 }
  0xdb   :  { %1926 = vmatmul.msk.f32.vlgmr.msra.gmra.mxu1 %vm310_vm4, %v2378_v0  ;;  %1934 = vmatpush.msk.msra.mxu2 %vm2527_vm8, %v180_v24  ;;  %v177_v17 = vsel %vm172_vm2, %v2167_v16, %v2171_v18  ;;  %v2604_v61 = vperm.slane %v77_v54, 0  ;;  %v173_v30 = vsel %vm172_vm2, %v2171_v18, %v2215_v35  ;;  %v2616_v34 = vperm.slane %v85_v51, 0 }
  0xdc   :  { %1946 = vmatpush.msk.msra.mxu3 %vm2542_vm9, %v176_v7  ;;  %1452 = vperm.xlu2 %1968, %v2553_v20   ;;  %3517 = vst [vmem:[#allocation23_spill] sm:$0xff] %v2602_v29  ;;  %v81_v16 = vrot.slane %v2202_v31, 2  ;;  %v3467_v18 = vperm.slane %v2202_v31, 0  ;;  %v2656_v7 = vunpack.c.0.s8 %v469_v4 }
  0xdd   :  { %1935 = vmatpush.msk.msra.mxu2 %vm2527_vm8, %v179_v14  ;;  %3518 = vst [vmem:[#allocation24_spill] sm:$0xff] %v2604_v61 }
  0xde   :  { %1947 = vmatpush.msk.msra.mxu3 %vm2542_vm9, %v175_v23  ;;  %3519 = vst [vmem:[#allocation25_spill] sm:$0xff] %v2616_v34  ;;  %1444 = vperm.xlu0 %1969, %v2604_v61   ;;  %v2627_v35 = vperm.slane %v81_v16, 0 }
  0xdf   :  { %1936 = vmatpush.msk.msra.mxu2 %vm2527_vm8, %v178_v26  ;;  %3523 = vst [vmem:[#allocation29_spill] sm:$0xff] %v2656_v7 }
  0xe0   :  { %1948 = vmatpush.msk.msra.mxu3 %vm2542_vm9, %v174_v28  ;;  %1917 = vmatmul.msk.f32.gmra.mxu0 %vm310_vm4, %v50_v43  ;;  %3520 = vst [vmem:[#allocation26_spill] sm:$0xff] %v2627_v35 }
  0xe1   :  { %1937 = vmatpush.msk.msra.mxu2 %vm2527_vm8, %v177_v17 }
  0xe2   :  { %1949 = vmatpush.msk.msra.mxu3 %vm2542_vm9, %v173_v30  ;;  %1938 = vmatmul.msk.f32.vlgmr.msra.gmra.mxu2 %vm310_vm4, %v2378_v0 }
  0xe3   :  { %1927 = vmatmul.msk.f32.gmra.mxu1 %vm310_vm4, %v2447_v6  ;;  %1950 = vmatmul.msk.f32.vlgmr.msra.gmra.mxu3 %vm310_vm4, %v2378_v0  ;;  %v2639_v0 = vperm.slane %v86_v49, 0 }
  0xe4   :  { %1468 = vperm.xlu1 %1970, %v2602_v29   ;;  %1480 = vperm.xlu2 %1968, %v2616_v34  }
  0xe5   :  { %3521 = vst [vmem:[#allocation27_spill] sm:$0xff] %v2639_v0 }
  0xe6   :  { %1464 = vperm.xlu0 %1969, %v2627_v35  }
  0xea   :  { %1939 = vmatmul.msk.f32.gmra.mxu2 %vm310_vm4, %v2447_v6 }
  0xeb   :  { %1928 = vmatmul.msk.f32.gmra.mxu1 %vm310_vm4, %v2508_v10  ;;  %1951 = vmatmul.msk.f32.gmra.mxu3 %vm310_vm4, %v2447_v6 }
  0xec   :  { %1456 = vperm.xlu1 %1970, %v3467_v18  }
  0xee   :  { %1484 = vperm.xlu0 %1969, %v2639_v0  }
  0xf2   :  { %1940 = vmatmul.msk.f32.gmra.mxu2 %vm310_vm4, %v2508_v10 }
  0xf3   :  { %1929 = vmatmul.msk.f32.gmra.mxu1 %vm310_vm4, %v50_v43  ;;  %1952 = vmatmul.msk.f32.gmra.mxu3 %vm310_vm4, %v2508_v10 }
  0xfa   :  { %1941 = vmatmul.msk.f32.gmra.mxu2 %vm310_vm4, %v50_v43 }
  0xfb   :  { %1953 = vmatmul.msk.f32.gmra.mxu3 %vm310_vm4, %v50_v43 }
 0x145   :  { %v340_v38 = vpop.f32.mrf.mxu0 }
 0x146   :  { %v341_v52 = vadd.f32 %v340_v38, %v296_v3 }
 0x148   :  { %v442_v58 = vrot.slane %v341_v52, 4 }
 0x14d   :  { %v343_v62 = vpop.f32.mrf.mxu0 }
 0x14e   :  { %v344_v41 = vadd.f32 %v343_v62, %v300_v2 }
 0x150   :  { %v498_v23 = vrot.slane %v344_v41, 4 }
 0x158   :  { %v369_v60 = vpop.f32.mrf.mxu1 }
 0x159   :  { %v370_v63 = vadd.f32 %v369_v60, %v296_v3 }
 0x15b   :  { %v454_v57 = vrot.slane %v370_v63, 4 }
 0x160   :  { %v372_v10 = vpop.f32.mrf.mxu1 }
 0x161   :  { %v373_v13 = vadd.f32 %v372_v10, %v300_v2 }
 0x163   :  { %v510_v26 = vrot.slane %v373_v13, 4 }
 0x165   :  { %v398_v6 = vpop.f32.mrf.mxu2 }
 0x166   :  { %v399_v8 = vadd.f32 %v398_v6, %v296_v3  ;;  %v427_v33 = vpop.f32.mrf.mxu3 }
 0x167   :  { %v428_v1 = vadd.f32 %v427_v33, %v296_v3 }
 0x168   :  { %v439_v19 = vrot.slane %v399_v8, 4  ;;  %v443_v9 = vsel %vm440_vm10, %v399_v8, %v442_v58 }
 0x169   :  { %v451_v22 = vperm.slane %v443_v9, %v2649_v53  ;;  %v452_v11 = vrot.slane %v428_v1, 4  ;;  %v455_v12 = vsel %vm440_vm10, %v428_v1, %v454_v57 }
 0x16a   :  { %v441_v5 = vsel %vm440_vm10, %v439_v19, %v341_v52  ;;  %v463_v24 = vperm.slane %v455_v12, %v2649_v53 }
 0x16b   :  { %v447_v14 = vperm.slane %v441_v5, %v2649_v53  ;;  %v478_v25 = vrot.slane %v451_v22, 4  ;;  %v453_v54 = vsel %vm440_vm10, %v452_v11, %v370_v63 }
 0x16c   :  { %v476_v43 = vrot.slane %v463_v24, 4  ;;  %v459_v28 = vperm.slane %v453_v54, %v2649_v53 }
 0x16d   :  { %v466_v51 = vrot.slane %v447_v14, 4  ;;  %v479_v17 = vsel %vm440_vm10, %v463_v24, %v478_v25  ;;  %v401_v30 = vpop.f32.mrf.mxu2 }
 0x16e   :  { %v430_v16 = vpop.f32.mrf.mxu3  ;;  %v2663_v49 = vperm.slane %v479_v17, %v2656_v7  ;;  %v477_v38 = vsel %vm440_vm10, %v476_v43, %v451_v22  ;;  %v402_v60 = vadd.f32 %v401_v30, %v300_v2  ;;  %v464_v52 = vrot.slane %v459_v28, 4  ;;  %v2709_v30 = vpop.permute.xlu2 %307 }
 0x16f   :  { %v431_v3 = vadd.f32 %v430_v16, %v300_v2  ;;  %v2667_v40 = vperm.slane %v477_v38, %v2656_v7  ;;  %v467_v58 = vsel %vm440_vm10, %v459_v28, %v466_v51 }
 0x170   :  { %v683_v36 = vsel %vm664_vm11, %v2663_v49, 0.0  ;;  %v499_v63 = vsel %vm440_vm10, %v402_v60, %v498_v23  ;;  %v496_v4 = vrot.slane %v402_v60, 4  ;;  %v2683_v10 = vperm.slane %v467_v58, %v2656_v7  ;;  %v304_v23 = vpop.permute.xlu1 %303 }
 0x171   :  { %v511_v6 = vsel %vm440_vm10, %v431_v3, %v510_v26  ;;  %684 = vadd.xlane.f32.xlu0 %v683_v36  ;;  %v677_v33 = vsel %vm664_vm11, %v2667_v40, 0.0  ;;  %v492_v56 = vrot.slane %v2667_v40, 4  ;;  %v508_v2 = vrot.slane %v431_v3, 4 }
 0x172   :  { %v519_v8 = vperm.slane %v511_v6, %v2649_v53  ;;  %678 = vadd.xlane.f32.xlu1 %v677_v33  ;;  %v507_v62 = vperm.slane %v499_v63, %v2649_v53  ;;  %v465_v9 = vsel %vm440_vm10, %v464_v52, %v447_v14  ;;  %v497_v5 = vsel %vm440_vm10, %v496_v4, %v344_v41  ;;  %v346_v63 = vpop.f32.mrf.mxu0 }
 0x173   :  { %v2680_v1 = vsel %vm440_vm10, 0.0, %v492_v56  ;;  %v2689_v22 = vperm.slane %v465_v9, %v2656_v7  ;;  %v509_v11 = vsel %vm440_vm10, %v508_v2, %v373_v13  ;;  %v671_v25 = vsel %vm664_vm11, %v2683_v10, 0.0 }
 0x174   :  { %v532_v57 = vrot.slane %v519_v8, 4  ;;  %v680_v19 = vsel %vm664_vm11, %v2680_v1, 0.0  ;;  %v534_v24 = vrot.slane %v507_v62, 4  ;;  %v515_v14 = vperm.slane %v509_v11, %v2649_v53 }
 0x175   :  { %681 = vadd.xlane.f32.xlu2 %v680_v19  ;;  %v488_v54 = vrot.slane %v2689_v22, 4  ;;  %v665_v43 = vsel %vm664_vm11, %v2689_v22, 0.0  ;;  %v503_v41 = vperm.slane %v497_v5, %v2649_v53  ;;  %v404_v51 = vpop.f32.mrf.mxu2  ;;  %v494_v28 = vrot.slane %v2663_v49, 4 }
 0x176   :  { %v533_v12 = vsel %vm440_vm10, %v532_v57, %v507_v62  ;;  %v535_v17 = vsel %vm440_vm10, %v519_v8, %v534_v24  ;;  %v520_v60 = vrot.slane %v515_v14, 4  ;;  %v405_v3 = vadd.f32 %v404_v51, %v304_v23  ;;  %v375_v8 = vpop.f32.mrf.mxu1  ;;  %v433_v33 = vpop.f32.mrf.mxu3 }
 0x177   :  { %v2701_v26 = vsel %vm440_vm10, 0.0, %v488_v54  ;;  %v2704_v13 = vperm.slane %v533_v12, %v2656_v7  ;;  %v2714_v38 = vperm.slane %v535_v17, %v2656_v7  ;;  %v490_v52 = vrot.slane %v2683_v10, 4 }
 0x178   :  { %v668_v16 = vsel %vm664_vm11, %v2701_v26, 0.0  ;;  %v522_v6 = vrot.slane %v503_v41, 4  ;;  %v2720_v58 = vsel %vm440_vm10, 0.0, %v494_v28  ;;  %v347_v56 = vadd.f32 %v346_v63, %v304_v23  ;;  %v2730_v5 = vpop.permute.xlu1 %1368 }
 0x179   :  { %672 = vadd.xlane.f32.xlu0 %v671_v25  ;;  %v701_v36 = vsel %vm664_vm11, %v2704_v13, 0.0  ;;  %v376_v4 = vadd.f32 %v375_v8, %v304_v23  ;;  %v550_v2 = vrot.slane %v2714_v38, 4  ;;  %v552_v62 = vrot.slane %v405_v3, 4  ;;  %3524 = vst [vmem:[#allocation30_spill] sm:$0xff] %v2730_v5 }
 0x17a   :  { %666 = vadd.xlane.f32.xlu1 %v665_v43  ;;  %v686_v57 = vsel %vm664_vm11, %v2720_v58, 0.0  ;;  %v2726_v19 = vsel %vm440_vm10, 0.0, %v490_v52  ;;  %v521_v9 = vsel %vm440_vm10, %v520_v60, %v503_v41  ;;  %v434_v11 = vadd.f32 %v433_v33, %v304_v23 }
 0x17b   :  { %v523_v12 = vsel %vm440_vm10, %v515_v14, %v522_v6  ;;  %v566_v24 = vrot.slane %v376_v4, 4  ;;  %v674_v25 = vsel %vm664_vm11, %v2726_v19, 0.0  ;;  %v2735_v54 = vsel %vm440_vm10, 0.0, %v550_v2  ;;  %v2744_v14 = vpop.permute.xlu2 %1360  ;;  %v349_v2 = vpop.f32.mrf.mxu0 }
 0x17c   :  { %v2738_v43 = vperm.slane %v521_v9, %v2656_v7  ;;  %v554_v51 = vrot.slane %v347_v56, 4  ;;  %v553_v28 = vsel %vm440_vm10, %v552_v62, %v347_v56  ;;  %v2742_v23 = vperm.slane %v523_v12, %v2656_v7  ;;  %3525 = vst [vmem:[#allocation31_spill] sm:$0xff] %v2744_v14 }
 0x17d   :  { %669 = vadd.xlane.f32.xlu2 %v668_v16  ;;  %v567_v41 = vsel %vm440_vm10, %v434_v11, %v566_v24  ;;  %v564_v16 = vrot.slane %v434_v11, 4  ;;  %v710_v60 = vsel %vm664_vm11, %v2735_v54, 0.0  ;;  %v548_v33 = vrot.slane %v2704_v13, 4 }
 0x17e   :  { %v555_v17 = vsel %vm440_vm10, %v405_v3, %v554_v51  ;;  %v544_v52 = vrot.slane %v2738_v43, 4  ;;  %v575_v63 = vperm.slane %v567_v41, %v2649_v53  ;;  %v695_v6 = vsel %vm664_vm11, %v2742_v23, 0.0  ;;  %v2757_v3 = vpop.permute.xlu0 %1364  ;;  %v407_v51 = vpop.f32.mrf.mxu2 }
 0x17f   :  { %v563_v8 = vperm.slane %v555_v17, %v2649_v53  ;;  %3526 = vst [vmem:[#allocation32_spill] sm:$0xff] %v2757_v3  ;;  %v565_v56 = vsel %vm440_vm10, %v564_v16, %v376_v4  ;;  %v350_v4 = vadd.f32 %v349_v2, %v2709_v30 }
 0x180   :  { %v2763_v9 = vsel %vm440_vm10, 0.0, %v544_v52  ;;  %v2765_v11 = vpop.permute.xlu1 %1376  ;;  %v588_v12 = vrot.slane %v575_v63, 4  ;;  %v408_v52 = vadd.f32 %v407_v51, %v2709_v30 }
 0x181   :  { %702 = vadd.xlane.f32.xlu0 %v701_v36  ;;  %v559_v36 = vperm.slane %v553_v28, %v2649_v53  ;;  %3527 = vst [vmem:[#allocation33_spill] sm:$0xff] %v2765_v11  ;;  %v590_v24 = vrot.slane %v563_v8, 4  ;;  %v2769_v28 = vsel %vm440_vm10, 0.0, %v548_v33  ;;  %v692_v41 = vsel %vm664_vm11, %v2763_v9, 0.0  ;;  %v436_v33 = vpop.f32.mrf.mxu3 }
 0x182   :  { %687 = vadd.xlane.f32.xlu1 %v686_v57  ;;  %v707_v57 = vsel %vm664_vm11, %v2714_v38, 0.0 }
 0x183   :  { %v578_v62 = vrot.slane %v559_v36, 4  ;;  %v2774_v17 = vpop.permute.xlu2 %1372  ;;  %v591_v2 = vsel %vm440_vm10, %v575_v63, %v590_v24  ;;  %v546_v24 = vrot.slane %v2742_v23, 4 }
 0x184   :  { %3528 = vst [vmem:[#allocation34_spill] sm:$0xff] %v2774_v17  ;;  %v2796_v63 = vperm.slane %v591_v2, %v2656_v7 }
 0x185   :  { %675 = vadd.xlane.f32.xlu2 %v674_v25  ;;  %v571_v25 = vperm.slane %v565_v56, %v2649_v53  ;;  %v589_v56 = vsel %vm440_vm10, %v588_v12, %v563_v8  ;;  %v437_v12 = vadd.f32 %v436_v33, %v2709_v30  ;;  %v2808_v33 = vsel %vm440_vm10, 0.0, %v546_v24 }
 0x186   :  { %v2789_v51 = vperm.slane %v589_v56, %v2656_v7  ;;  %v2791_v11 = vpop.permute.xlu0 %1384 }
 0x187   :  { %v579_v16 = vsel %vm440_vm10, %v571_v25, %v578_v62  ;;  %v689_v62 = vsel %vm664_vm11, %v2738_v43, 0.0  ;;  %3529 = vst [vmem:[#allocation35_spill] sm:$0xff] %v2791_v11  ;;  %v620_v3 = vrot.slane %v437_v12, 4 }
 0x188   :  { %v2783_v18 = vperm.slane %v579_v16, %v2656_v7  ;;  %v576_v16 = vrot.slane %v571_v25, 4  ;;  %v604_v14 = vrot.slane %v2789_v51, 4  ;;  %v608_v25 = vrot.slane %v408_v52, 4 }
 0x189   :  { %711 = vadd.xlane.f32.xlu0 %v710_v60  ;;  %v378_v60 = vpop.f32.mrf.mxu1 }
 0x18a   :  { %696 = vadd.xlane.f32.xlu1 %v695_v6  ;;  %v704_v6 = vsel %vm664_vm11, %v2769_v28, 0.0  ;;  %v2817_v17 = vsel %vm440_vm10, 0.0, %v604_v14 }
 0x18b   :  { %v2810_v2 = vpop.permute.xlu2 %1380 }
 0x18c   :  { %3531 = vst [vmem:[#allocation37_spill] sm:$0xff] %v2810_v2 }
 0x18d   :  { %708 = vadd.xlane.f32.xlu2 %v707_v57  ;;  %v610_v57 = vrot.slane %v350_v4, 4 }
 0x18f   :  { %v611_v8 = vsel %vm440_vm10, %v408_v52, %v610_v57  ;;  %v609_v52 = vsel %vm440_vm10, %v608_v25, %v350_v4  ;;  %v602_v4 = vrot.slane %v2783_v18, 4 }
 0x190   :  { %v619_v56 = vperm.slane %v611_v8, %v2649_v53 }
 0x191   :  { %693 = vadd.xlane.f32.xlu0 %v692_v41  ;;  %v379_v41 = vadd.f32 %v378_v60, %v2709_v30  ;;  %v2799_v60 = vpop.permute.xlu1 %1388  ;;  %v731_v30 = vsel %vm664_vm11, %v2796_v63, 0.0 }
 0x192   :  { %705 = vadd.xlane.f32.xlu1 %v704_v6  ;;  %3530 = vst [vmem:[#allocation36_spill] sm:$0xff] %v2799_v60  ;;  %v719_v6 = vsel %vm664_vm11, %v2783_v18, 0.0  ;;  %v646_v8 = vrot.slane %v619_v56, 4 }
 0x193   :  { %v622_v57 = vrot.slane %v379_v41, 4  ;;  %v621_v11 = vsel %vm440_vm10, %v620_v3, %v379_v41  ;;  %v615_v3 = vperm.slane %v609_v52, %v2649_v53  ;;  %v2840_v25 = vpop.permute.xlu2 %1392 }
 0x194   :  { %3534 = vst [vmem:[#allocation40_spill] sm:$0xff] %v2840_v25 }
 0x195   :  { %690 = vadd.xlane.f32.xlu2 %v689_v62  ;;  %v577_v62 = vsel %vm440_vm10, %v576_v16, %v559_v36  ;;  %v623_v60 = vsel %vm440_vm10, %v437_v12, %v622_v57  ;;  %v2825_v36 = vpop.permute.xlu0 %1396  ;;  %v728_v12 = vsel %vm664_vm11, %v2817_v17, 0.0  ;;  %v627_v16 = vperm.slane %v621_v11, %v2649_v53 }
 0x196   :  { %v2821_v24 = vperm.slane %v577_v62, %v2656_v7  ;;  %3532 = vst [vmem:[#allocation38_spill] sm:$0xff] %v2825_v36  ;;  %v725_v11 = vsel %vm664_vm11, %v2789_v51, 0.0 }
 0x197   :  { %v632_v62 = vrot.slane %v627_v16, 4 }
 0x198   :  { %v713_v41 = vsel %vm664_vm11, %v2821_v24, 0.0 }
 0x199   :  { %720 = vadd.xlane.f32.xlu0 %v719_v6  ;;  %v698_v6 = vsel %vm664_vm11, %v2808_v33, 0.0  ;;  %v2831_v57 = vpop.permute.xlu1 %1400 }
 0x19a   :  { %732 = vadd.xlane.f32.xlu1 %v731_v30  ;;  %v631_v30 = vperm.slane %v623_v60, %v2649_v53  ;;  %3533 = vst [vmem:[#allocation39_spill] sm:$0xff] %v2831_v57 }
 0x19c   :  { %v647_v14 = vsel %vm440_vm10, %v631_v30, %v646_v8  ;;  %v634_v8 = vrot.slane %v615_v3, 4  ;;  %v644_v52 = vrot.slane %v631_v30, 4 }
 0x19d   :  { %699 = vadd.xlane.f32.xlu2 %v698_v6  ;;  %v2838_v60 = vperm.slane %v647_v14, %v2656_v7  ;;  %v606_v6 = vrot.slane %v2796_v63, 4  ;;  %v633_v14 = vsel %vm440_vm10, %v632_v62, %v615_v3  ;;  %v2851_v57 = vpop.permute.xlu0 %1408 }
 0x19e   :  { %3535 = vst [vmem:[#allocation41_spill] sm:$0xff] %v2851_v57  ;;  %v645_v30 = vsel %vm440_vm10, %v644_v52, %v619_v56  ;;  %v2863_v53 = vperm.slane %v633_v14, %v2656_v7 }
 0x19f   :  { %v2856_v2 = vsel %vm440_vm10, 0.0, %v606_v6  ;;  %v2871_v6 = vperm.slane %v645_v30, %v2656_v7  ;;  %v662_v14 = vrot.slane %v2838_v60, 4 }
 0x1a0   :  { %v734_v3 = vsel %vm664_vm11, %v2856_v2, 0.0  ;;  %v737_v56 = vsel %vm664_vm11, %v2863_v53, 0.0 }
 0x1a1   :  { %729 = vadd.xlane.f32.xlu0 %v728_v12  ;;  %v2846_v12 = vsel %vm440_vm10, 0.0, %v602_v4  ;;  %v2860_v4 = vpop.permute.xlu1 %1412  ;;  %v749_v52 = vsel %vm664_vm11, %v2871_v6, 0.0 }
 0x1a2   :  { %714 = vadd.xlane.f32.xlu1 %v713_v41  ;;  %v755_v41 = vsel %vm664_vm11, %v2838_v60, 0.0  ;;  %v722_v25 = vsel %vm664_vm11, %v2846_v12, 0.0  ;;  %3536 = vst [vmem:[#allocation42_spill] sm:$0xff] %v2860_v4  ;;  %v2895_v4 = vsel %vm440_vm10, 0.0, %v662_v14  ;;  %v660_v14 = vrot.slane %v2871_v6, 4 }
 0x1a5   :  { %726 = vadd.xlane.f32.xlu2 %v725_v11  ;;  %v635_v11 = vsel %vm440_vm10, %v627_v16, %v634_v8  ;;  %v600_v16 = vrot.slane %v2821_v24, 4 }
 0x1a6   :  { %v2868_v62 = vperm.slane %v635_v11, %v2656_v7  ;;  %v2885_v11 = vpop.permute.xlu0 %1420  ;;  %v656_v7 = vrot.slane %v2863_v53, 4 }
 0x1a7   :  { %3538 = vst [vmem:[#allocation44_spill] sm:$0xff] %v2885_v11  ;;  %v758_v11 = vsel %vm664_vm11, %v2895_v4, 0.0 }
 0x1a8   :  { %v658_v8 = vrot.slane %v2868_v62, 4 }
 0x1a9   :  { %756 = vadd.xlane.f32.xlu0 %v755_v41  ;;  %v2882_v41 = vsel %vm440_vm10, 0.0, %v600_v16 }
 0x1aa   :  { %723 = vadd.xlane.f32.xlu1 %v722_v25  ;;  %v2874_v25 = vpop.permute.xlu2 %1404  ;;  %v716_v30 = vsel %vm664_vm11, %v2882_v41, 0.0 }
 0x1ab   :  { %3537 = vst [vmem:[#allocation43_spill] sm:$0xff] %v2874_v25 }
 0x1ad   :  { %735 = vadd.xlane.f32.xlu2 %v734_v3  ;;  %v2890_v3 = vsel %vm440_vm10, 0.0, %v658_v8  ;;  %v743_v8 = vsel %vm664_vm11, %v2868_v62, 0.0 }
 0x1ae   :  { %v746_v16 = vsel %vm664_vm11, %v2890_v3, 0.0 }
 0x1b1   :  { %738 = vadd.xlane.f32.xlu0 %v737_v56  ;;  %v2892_v56 = vpop.permute.xlu1 %1424 }
 0x1b2   :  { %750 = vadd.xlane.f32.xlu1 %v749_v52  ;;  %3539 = vst [vmem:[#allocation45_spill] sm:$0xff] %v2892_v56  ;;  %v2899_v52 = vpop.permute.xlu2 %1416  ;;  %v2906_v56 = vpop.permute.xlu0 %1432 }
 0x1b3   :  { %3540 = vst [vmem:[#allocation46_spill] sm:$0xff] %v2899_v52 }
 0x1b4   :  { %3541 = vst [vmem:[#allocation47_spill] sm:$0xff] %v2906_v56 }
 0x1b5   :  { %717 = vadd.xlane.f32.xlu2 %v716_v30  ;;  %v2910_v30 = vsel %vm440_vm10, 0.0, %v656_v7 }
 0x1b9   :  { %747 = vadd.xlane.f32.xlu0 %v746_v16  ;;  %v2912_v57 = vpop.permute.xlu1 %1436  ;;  %v740_v16 = vsel %vm664_vm11, %v2910_v30, 0.0 }
 0x1ba   :  { %759 = vadd.xlane.f32.xlu1 %v758_v11  ;;  %3542 = vst [vmem:[#allocation48_spill] sm:$0xff] %v2912_v57  ;;  %v2917_v11 = vsel %vm440_vm10, 0.0, %v660_v14  ;;  %v2919_v52 = vpop.permute.xlu2 %1428 }
 0x1bb   :  { %3543 = vst [vmem:[#allocation49_spill] sm:$0xff] %v2919_v52  ;;  %v752_v56 = vsel %vm664_vm11, %v2917_v11, 0.0 }
 0x1bd   :  { %744 = vadd.xlane.f32.xlu2 %v743_v8  ;;  %v2923_v8 = vpop.permute.xlu0 %1444 }
 0x1be   :  { %3544 = vst [vmem:[#allocation50_spill] sm:$0xff] %v2923_v8 }
 0x1c1   :  { %v2925_v36 = vpop.permute.xlu1 %1448 }
 0x1c2   :  { %741 = vadd.xlane.f32.xlu1 %v740_v16  ;;  %3545 = vst [vmem:[#allocation51_spill] sm:$0xff] %v2925_v36  ;;  %v2927_v7 = vpop.permute.xlu2 %1440 }
 0x1c3   :  { %3546 = vst [vmem:[#allocation52_spill] sm:$0xff] %v2927_v7 }
 0x1c5   :  { %753 = vadd.xlane.f32.xlu2 %v752_v56  ;;  %v2929_v57 = vpop.permute.xlu0 %1464 }
 0x1c6   :  { %3547 = vst [vmem:[#allocation53_spill] sm:$0xff] %v2929_v57 }
 0x1c9   :  { %v2931_v25 = vpop.permute.xlu1 %1468 }
 0x1ca   :  { %3548 = vst [vmem:[#allocation54_spill] sm:$0xff] %v2931_v25  ;;  %v2933_v5 = vpop.permute.xlu2 %1452 }
 0x1cb   :  { %3549 = vst [vmem:[#allocation55_spill] sm:$0xff] %v2933_v5 }
 0x1cd   :  { %v2935_v14 = vpop.permute.xlu0 %1484 }
 0x1ce   :  { %3550 = vst [vmem:[#allocation56_spill] sm:$0xff] %v2935_v14 }
 0x1d1   :  { %v2937_v52 = vpop.permute.xlu1 %1456 }
 0x1d2   :  { %3551 = vst [vmem:[#allocation57_spill] sm:$0xff] %v2937_v52  ;;  %v2939_v16 = vpop.permute.xlu2 %1480 }
 0x1d3   :  { %3552 = vst [vmem:[#allocation58_spill] sm:$0xff] %v2939_v16 }
 0x1e4   :  { %v685_v0 = vpop.xlane.xlu0 %684 }
 0x1e5   :  { %v679_v56 = vpop.xlane.xlu1 %678 }
 0x1e6   :  { %v768_v31 = vsel %vm664_vm11, %v679_v56, 0.0 }
 0x1e8   :  { %v682_v34 = vpop.xlane.xlu2 %681 }
 0x1e9   :  { %v770_v32 = vsel %vm664_vm11, %v682_v34, 0.0 }
 0x1ec   :  { %v673_v8 = vpop.xlane.xlu0 %672 }
 0x1ed   :  { %v667_v35 = vpop.xlane.xlu1 %666  ;;  %v764_v5 = vsel %vm664_vm11, %v673_v8, 0.0 }
 0x1ee   :  { %v761_v57 = vsel %vm664_vm11, %v667_v35, 0.0  ;;  %v772_v35 = vsel %vm664_vm11, %v685_v0, 0.0 }
 0x1f0   :  { %v670_v36 = vpop.xlane.xlu2 %669 }
 0x1f1   :  { %v762_v7 = vsel %vm664_vm11, %v670_v36, 0.0 }
 0x1f2   :  { %v763_v29 = vadd.f32 %v762_v7, %v761_v57 }
 0x1f4   :  { %v703_v25 = vpop.xlane.xlu0 %702  ;;  %v765_v20 = vadd.f32 %v764_v5, %v763_v29 }
 0x1f5   :  { %v688_v15 = vpop.xlane.xlu1 %687 }
 0x1f6   :  { %v774_v8 = vsel %vm664_vm11, %v688_v15, 0.0  ;;  %v784_v15 = vsel %vm664_vm11, %v703_v25, 0.0 }
 0x1f8   :  { %v676_v14 = vpop.xlane.xlu2 %675 }
 0x1f9   :  { %v766_v52 = vsel %vm664_vm11, %v676_v14, 0.0 }
 0x1fa   :  { %v767_v16 = vadd.f32 %v766_v52, %v765_v20 }
 0x1fc   :  { %v769_v45 = vadd.f32 %v768_v31, %v767_v16  ;;  %v712_v61 = vpop.xlane.xlu0 %711 }
 0x1fd   :  { %v697_v42 = vpop.xlane.xlu1 %696 }
 0x1fe   :  { %v771_v36 = vadd.f32 %v770_v32, %v769_v45  ;;  %v780_v32 = vsel %vm664_vm11, %v697_v42, 0.0 }
 0x200   :  { %v709_v55 = vpop.xlane.xlu2 %708  ;;  %v773_v57 = vadd.f32 %v772_v35, %v771_v36 }
 0x202   :  { %v775_v5 = vadd.f32 %v774_v8, %v773_v57 }
 0x204   :  { %v694_v21 = vpop.xlane.xlu0 %693 }
 0x205   :  { %v706_v7 = vpop.xlane.xlu1 %705  ;;  %v778_v31 = vsel %vm664_vm11, %v694_v21, 0.0  ;;  %v788_v21 = vsel %vm664_vm11, %v709_v55, 0.0 }
 0x206   :  { %v786_v57 = vsel %vm664_vm11, %v706_v7, 0.0 }
 0x208   :  { %v691_v29 = vpop.xlane.xlu2 %690 }
 0x209   :  { %v776_v20 = vsel %vm664_vm11, %v691_v29, 0.0 }
 0x20a   :  { %v777_v52 = vadd.f32 %v776_v20, %v775_v5 }
 0x20c   :  { %v779_v14 = vadd.f32 %v778_v31, %v777_v52  ;;  %v721_v56 = vpop.xlane.xlu0 %720  ;;  %v790_v52 = vsel %vm664_vm11, %v712_v61, 0.0 }
 0x20d   :  { %v2951_v16 = vpop.xlane.xlu1 %732 }
 0x20e   :  { %v781_v34 = vadd.f32 %v780_v32, %v779_v14 }
 0x210   :  { %v700_v45 = vpop.xlane.xlu2 %699 }
 0x211   :  { %v782_v0 = vsel %vm664_vm11, %v700_v45, 0.0 }
 0x212   :  { %v783_v36 = vadd.f32 %v782_v0, %v781_v34 }
 0x214   :  { %v785_v35 = vadd.f32 %v784_v15, %v783_v36  ;;  %v730_v14 = vpop.xlane.xlu0 %729 }
 0x215   :  { %v715_v8 = vpop.xlane.xlu1 %714 }
 0x216   :  { %v787_v29 = vadd.f32 %v786_v57, %v785_v35 }
 0x218   :  { %v789_v5 = vadd.f32 %v788_v21, %v787_v29  ;;  %v727_v20 = vpop.xlane.xlu2 %726 }
 0x21a   :  { %v791_v42 = vadd.f32 %v790_v52, %v789_v5  ;;  %v792_v52 = vsel %vm664_vm11, %v715_v8, 0.0 }
 0x21c   :  { %v2959_v31 = vmul.f32 0.00048828125, %v791_v42 }
 0x21d   :  { %v724_v32 = vpop.xlane.xlu1 %723 }
 0x21e   :  { %v2963_v45 = vsub.f32 %v2683_v10, %v2959_v31  ;;  %v2967_v25 = vsub.f32 %v2701_v26, %v2959_v31  ;;  %v2971_v55 = vsub.f32 %v2689_v22, %v2959_v31  ;;  %v2981_v10 = vsub.f32 %v2680_v1, %v2959_v31  ;;  %v2996_v1 = vpop.xlane.xlu0 %756 }
 0x21f   :  { %v2988_v15 = vsub.f32 %v2667_v40, %v2959_v31  ;;  %v2992_v35 = vsub.f32 %v2726_v19, %v2959_v31  ;;  %v3008_v42 = vsub.f32 %v2738_v43, %v2959_v31 }
 0x220   :  { %v736_v7 = vpop.xlane.xlu2 %735  ;;  %v859_v61 = vmul.f32 %v2963_v45, %v2963_v45  ;;  %v858_v34 = vmul.f32 %v2967_v25, %v2967_v25  ;;  %v857_v0 = vmul.f32 %v2971_v55, %v2971_v55  ;;  %v862_v29 = vmul.f32 %v2981_v10, %v2981_v10 }
 0x221   :  { %v861_v21 = vmul.f32 %v2988_v15, %v2988_v15  ;;  %v860_v40 = vmul.f32 %v2992_v35, %v2992_v35 }
 0x222   :  { %v895_v26 = vsel %vm664_vm11, %v859_v61, 0.0  ;;  %v892_v36 = vsel %vm664_vm11, %v858_v34, 0.0  ;;  %v889_v22 = vsel %vm664_vm11, %v857_v0, 0.0  ;;  %v904_v34 = vsel %vm664_vm11, %v862_v29, 0.0 }
 0x223   :  { %896 = vadd.xlane.f32.xlu1 %v895_v26  ;;  %893 = vadd.xlane.f32.xlu0 %v892_v36  ;;  %v901_v0 = vsel %vm664_vm11, %v861_v21, 0.0  ;;  %v3014_v26 = vsub.f32 %v2720_v58, %v2959_v31  ;;  %v795_v36 = vsel %vm664_vm11, %v721_v56, 0.0  ;;  %v898_v8 = vsel %vm664_vm11, %v860_v40, 0.0 }
 0x224   :  { %890 = vadd.xlane.f32.xlu2 %v889_v22  ;;  %v3020_v22 = vsub.f32 %v2663_v49, %v2959_v31  ;;  %v797_v29 = vsel %vm664_vm11, %v724_v32, 0.0  ;;  %v865_v58 = vmul.f32 %v3008_v42, %v3008_v42 }
 0x225   :  { %v2994_v57 = vpop.xlane.xlu1 %750  ;;  %v864_v56 = vmul.f32 %v3014_v26, %v3014_v26 }
 0x226   :  { %v863_v40 = vmul.f32 %v3020_v22, %v3020_v22  ;;  %v739_v49 = vpop.xlane.xlu0 %738  ;;  %v913_v32 = vsel %vm664_vm11, %v865_v58, 0.0 }
 0x228   :  { %v718_v5 = vpop.xlane.xlu2 %717 }
 0x229   :  { %v793_v19 = vsel %vm664_vm11, %v718_v5, 0.0 }
 0x22a   :  { %v794_v61 = vadd.f32 %v793_v19, %v792_v52  ;;  %v799_v52 = vsel %vm664_vm11, %v727_v20, 0.0  ;;  %v803_v20 = vsel %vm664_vm11, %v2951_v16, 0.0 }
 0x22b   :  { %905 = vadd.xlane.f32.xlu1 %v904_v34  ;;  %902 = vadd.xlane.f32.xlu0 %v901_v0  ;;  %v910_v34 = vsel %vm664_vm11, %v864_v56, 0.0 }
 0x22c   :  { %v796_v43 = vadd.f32 %v795_v36, %v794_v61  ;;  %899 = vadd.xlane.f32.xlu2 %v898_v8  ;;  %v801_v61 = vsel %vm664_vm11, %v730_v14, 0.0  ;;  %v3037_v36 = vsub.f32 %v2808_v33, %v2959_v31  ;;  %v3041_v8 = vsub.f32 %v2742_v23, %v2959_v31 }
 0x22d   :  { %v3023_v5 = vpop.xlane.xlu1 %759  ;;  %v907_v14 = vsel %vm664_vm11, %v863_v40, 0.0  ;;  %v805_v33 = vsel %vm664_vm11, %v736_v7, 0.0 }
 0x22e   :  { %v798_v21 = vadd.f32 %v797_v29, %v796_v43  ;;  %v3048_v43 = vsub.f32 %v2763_v9, %v2959_v31  ;;  %v868_v23 = vmul.f32 %v3037_v36, %v3037_v36  ;;  %v867_v16 = vmul.f32 %v3041_v8, %v3041_v8  ;;  %v748_v7 = vpop.xlane.xlu0 %747 }
 0x230   :  { %v800_v19 = vadd.f32 %v799_v52, %v798_v21  ;;  %v745_v29 = vpop.xlane.xlu2 %744  ;;  %v807_v52 = vsel %vm664_vm11, %v739_v49, 0.0  ;;  %v866_v40 = vmul.f32 %v3048_v43, %v3048_v43 }
 0x231   :  { %v811_v49 = vsel %vm664_vm11, %v745_v29, 0.0 }
 0x232   :  { %v802_v0 = vadd.f32 %v801_v61, %v800_v19  ;;  %v3061_v61 = vsub.f32 %v2714_v38, %v2959_v31  ;;  %v3073_v38 = vsub.f32 %v2704_v13, %v2959_v31 }
 0x233   :  { %914 = vadd.xlane.f32.xlu1 %v913_v32  ;;  %911 = vadd.xlane.f32.xlu0 %v910_v34  ;;  %v922_v34 = vsel %vm664_vm11, %v868_v23, 0.0  ;;  %v815_v23 = vsel %vm664_vm11, %v2994_v57, 0.0  ;;  %v3092_v57 = vsub.f32 %v2735_v54, %v2959_v31 }
 0x234   :  { %908 = vadd.xlane.f32.xlu2 %v907_v14  ;;  %v804_v58 = vadd.f32 %v803_v20, %v802_v0  ;;  %v919_v0 = vsel %vm664_vm11, %v867_v16, 0.0  ;;  %v3067_v20 = vsub.f32 %v2769_v28, %v2959_v31  ;;  %v916_v14 = vsel %vm664_vm11, %v866_v40, 0.0 }
 0x235   :  { %v742_v21 = vpop.xlane.xlu1 %741  ;;  %v871_v28 = vmul.f32 %v3061_v61, %v3061_v61  ;;  %v869_v16 = vmul.f32 %v3073_v38, %v3073_v38 }
 0x236   :  { %v806_v56 = vadd.f32 %v805_v33, %v804_v58  ;;  %v809_v19 = vsel %vm664_vm11, %v742_v21, 0.0  ;;  %v813_v33 = vsel %vm664_vm11, %v748_v7, 0.0  ;;  %v870_v29 = vmul.f32 %v3067_v20, %v3067_v20 }
 0x237   :  { %v819_v7 = vsel %vm664_vm11, %v2996_v1, 0.0 }
 0x238   :  { %v808_v9 = vadd.f32 %v807_v52, %v806_v56  ;;  %v754_v21 = vpop.xlane.xlu2 %753 }
 0x239   :  { %v817_v52 = vsel %vm664_vm11, %v754_v21, 0.0 }
 0x23a   :  { %v810_v32 = vadd.f32 %v809_v19, %v808_v9  ;;  %v931_v9 = vsel %vm664_vm11, %v871_v28, 0.0  ;;  %v928_v19 = vsel %vm664_vm11, %v870_v29, 0.0 }
 0x23b   :  { %923 = vadd.xlane.f32.xlu1 %v922_v34  ;;  %920 = vadd.xlane.f32.xlu0 %v919_v0  ;;  %v821_v0 = vsel %vm664_vm11, %v3023_v5, 0.0 }
 0x23c   :  { %v812_v58 = vadd.f32 %v811_v49, %v810_v32  ;;  %917 = vadd.xlane.f32.xlu2 %v916_v14  ;;  %v925_v32 = vsel %vm664_vm11, %v869_v16, 0.0  ;;  %v872_v14 = vmul.f32 %v3092_v57, %v3092_v57 }
 0x23e   :  { %v814_v56 = vadd.f32 %v813_v33, %v812_v58  ;;  %v934_v21 = vsel %vm664_vm11, %v872_v14, 0.0 }
 0x240   :  { %v816_v13 = vadd.f32 %v815_v23, %v814_v56 }
 0x242   :  { %v818_v40 = vadd.f32 %v817_v52, %v816_v13 }
 0x243   :  { %932 = vadd.xlane.f32.xlu1 %v931_v9  ;;  %929 = vadd.xlane.f32.xlu0 %v928_v19 }
 0x244   :  { %v820_v34 = vadd.f32 %v819_v7, %v818_v40  ;;  %926 = vadd.xlane.f32.xlu2 %v925_v32 }
 0x246   :  { %v822_v49 = vadd.f32 %v821_v0, %v820_v34 }
 0x248   :  { %v824_v58 = vmul.f32 0.00048828125, %v822_v49 }
 0x24a   :  { %v3099_v1 = vsub.f32 %v2882_v41, %v824_v58  ;;  %v3102_v33 = vsub.f32 %v2821_v24, %v824_v58  ;;  %v3106_v54 = vsub.f32 %v2783_v18, %v824_v58  ;;  %v3115_v28 = vsub.f32 %v2789_v51, %v824_v58 }
 0x24b   :  { %v3118_v24 = vsub.f32 %v2846_v12, %v824_v58  ;;  %v3128_v13 = vsub.f32 %v2817_v17, %v824_v58  ;;  %v3133_v52 = vsub.f32 %v2856_v2, %v824_v58  ;;  %v3136_v40 = vsub.f32 %v2796_v63, %v824_v58 }
 0x24c   :  { %935 = vadd.xlane.f32.xlu2 %v934_v21  ;;  %v874_v31 = vmul.f32 %v3099_v1, %v3099_v1  ;;  %v873_v5 = vmul.f32 %v3102_v33, %v3102_v33  ;;  %v875_v18 = vmul.f32 %v3106_v54, %v3106_v54  ;;  %v877_v29 = vmul.f32 %v3115_v28, %v3115_v28 }
 0x24d   :  { %v876_v23 = vmul.f32 %v3118_v24, %v3118_v24  ;;  %v878_v9 = vmul.f32 %v3128_v13, %v3128_v13  ;;  %v880_v17 = vmul.f32 %v3133_v52, %v3133_v52  ;;  %v879_v19 = vmul.f32 %v3136_v40, %v3136_v40 }
 0x24e   :  { %v940_v56 = vsel %vm664_vm11, %v874_v31, 0.0  ;;  %v937_v41 = vsel %vm664_vm11, %v873_v5, 0.0  ;;  %v943_v16 = vsel %vm664_vm11, %v875_v18, 0.0  ;;  %v949_v51 = vsel %vm664_vm11, %v877_v29, 0.0 }
 0x24f   :  { %941 = vadd.xlane.f32.xlu1 %v940_v56  ;;  %938 = vadd.xlane.f32.xlu0 %v937_v41  ;;  %v946_v12 = vsel %vm664_vm11, %v876_v23, 0.0  ;;  %v952_v7 = vsel %vm664_vm11, %v878_v9, 0.0  ;;  %v3146_v32 = vsub.f32 %v2863_v53, %v824_v58  ;;  %v958_v63 = vsel %vm664_vm11, %v880_v17, 0.0 }
 0x250   :  { %v955_v2 = vsel %vm664_vm11, %v879_v19, 0.0  ;;  %v3151_v34 = vsub.f32 %v2868_v62, %v824_v58  ;;  %v3154_v0 = vsub.f32 %v2910_v30, %v824_v58  ;;  %v3164_v31 = vsub.f32 %v2890_v3, %v824_v58 }
 0x251   :  { %v881_v49 = vmul.f32 %v3146_v32, %v3146_v32  ;;  %v3169_v5 = vsub.f32 %v2917_v11, %v824_v58  ;;  %v3172_v56 = vsub.f32 %v2871_v6, %v824_v58  ;;  %v3182_v23 = vsub.f32 %v2838_v60, %v824_v58 }
 0x252   :  { %v883_v53 = vmul.f32 %v3151_v34, %v3151_v34  ;;  %v882_v14 = vmul.f32 %v3154_v0, %v3154_v0  ;;  %v884_v41 = vmul.f32 %v3164_v31, %v3164_v31 }
 0x253   :  { %v961_v21 = vsel %vm664_vm11, %v881_v49, 0.0  ;;  %v886_v3 = vmul.f32 %v3169_v5, %v3169_v5  ;;  %v885_v18 = vmul.f32 %v3172_v56, %v3172_v56 }
 0x254   :  { %944 = vadd.xlane.f32.xlu2 %v943_v16  ;;  %v967_v62 = vsel %vm664_vm11, %v883_v53, 0.0  ;;  %v964_v30 = vsel %vm664_vm11, %v882_v14, 0.0  ;;  %v970_v29 = vsel %vm664_vm11, %v884_v41, 0.0  ;;  %v3187_v16 = vsub.f32 %v2895_v4, %v824_v58 }
 0x255   :  { %v976_v6 = vsel %vm664_vm11, %v886_v3, 0.0  ;;  %v973_v11 = vsel %vm664_vm11, %v885_v18, 0.0 }
 0x257   :  { %950 = vadd.xlane.f32.xlu1 %v949_v51  ;;  %947 = vadd.xlane.f32.xlu0 %v946_v12  ;;  %v887_v51 = vmul.f32 %v3182_v23, %v3182_v23  ;;  %v888_v12 = vmul.f32 %v3187_v16, %v3187_v16 }
 0x259   :  { %v979_v9 = vsel %vm664_vm11, %v887_v51, 0.0  ;;  %v982_v60 = vsel %vm664_vm11, %v888_v12, 0.0 }
 0x25c   :  { %953 = vadd.xlane.f32.xlu2 %v952_v7 }
 0x25f   :  { %959 = vadd.xlane.f32.xlu1 %v958_v63  ;;  %956 = vadd.xlane.f32.xlu0 %v955_v2 }
 0x264   :  { %962 = vadd.xlane.f32.xlu2 %v961_v21 }
 0x267   :  { %968 = vadd.xlane.f32.xlu1 %v967_v62  ;;  %965 = vadd.xlane.f32.xlu0 %v964_v30 }
 0x26c   :  { %971 = vadd.xlane.f32.xlu2 %v970_v29 }
 0x26f   :  { %977 = vadd.xlane.f32.xlu1 %v976_v6  ;;  %974 = vadd.xlane.f32.xlu0 %v973_v11 }
 0x274   :  { %980 = vadd.xlane.f32.xlu2 %v979_v9 }
 0x277   :  { %983 = vadd.xlane.f32.xlu0 %v982_v60 }
 0x296   :  { %v897_v17 = vpop.xlane.xlu1 %896  ;;  %v894_v19 = vpop.xlane.xlu0 %893 }
 0x297   :  { %v891_v7 = vpop.xlane.xlu2 %890  ;;  %v986_v58 = vsel %vm664_vm11, %v894_v19, 0.0  ;;  %v988_v2 = vsel %vm664_vm11, %v897_v17, 0.0 }
 0x298   :  { %v985_v4 = vsel %vm664_vm11, %v891_v7, 0.0 }
 0x299   :  { %v987_v63 = vadd.f32 %v986_v58, %v985_v4 }
 0x29b   :  { %v989_v21 = vadd.f32 %v988_v2, %v987_v63 }
 0x29e   :  { %v906_v49 = vpop.xlane.xlu1 %905  ;;  %v903_v53 = vpop.xlane.xlu0 %902 }
 0x29f   :  { %v900_v14 = vpop.xlane.xlu2 %899  ;;  %v992_v41 = vsel %vm664_vm11, %v903_v53, 0.0  ;;  %v994_v18 = vsel %vm664_vm11, %v906_v49, 0.0 }
 0x2a0   :  { %v990_v62 = vsel %vm664_vm11, %v900_v14, 0.0 }
 0x2a1   :  { %v991_v30 = vadd.f32 %v990_v62, %v989_v21 }
 0x2a3   :  { %v993_v3 = vadd.f32 %v992_v41, %v991_v30 }
 0x2a5   :  { %v995_v51 = vadd.f32 %v994_v18, %v993_v3 }
 0x2a6   :  { %v915_v29 = vpop.xlane.xlu1 %914  ;;  %v912_v6 = vpop.xlane.xlu0 %911 }
 0x2a7   :  { %v909_v11 = vpop.xlane.xlu2 %908  ;;  %v998_v60 = vsel %vm664_vm11, %v912_v6, 0.0  ;;  %v1000_v19 = vsel %vm664_vm11, %v915_v29, 0.0 }
 0x2a8   :  { %v996_v12 = vsel %vm664_vm11, %v909_v11, 0.0  ;;  %v2059_v11 = vmov 1  }
 0x2a9   :  { %v997_v9 = vadd.f32 %v996_v12, %v995_v51  ;;  %1972 = vset.pattern.permute.xlu2 %v2059_v11  ;;  %1971 = vset.pattern.permute.xlu1 %v2059_v11 }
 0x2aa   :  { %1973 = vset.pattern.permute.xlu0 %v2059_v11 }
 0x2ab   :  { %v999_v17 = vadd.f32 %v998_v60, %v997_v9 }
 0x2ad   :  { %v1001_v58 = vadd.f32 %v1000_v19, %v999_v17 }
 0x2ae   :  { %v921_v7 = vpop.xlane.xlu0 %920  ;;  %v924_v63 = vpop.xlane.xlu1 %923 }
 0x2af   :  { %v918_v4 = vpop.xlane.xlu2 %917  ;;  %v1004_v49 = vsel %vm664_vm11, %v921_v7, 0.0  ;;  %v1006_v21 = vsel %vm664_vm11, %v924_v63, 0.0 }
 0x2b0   :  { %v1002_v2 = vsel %vm664_vm11, %v918_v4, 0.0 }
 0x2b1   :  { %v1003_v53 = vadd.f32 %v1002_v2, %v1001_v58 }
 0x2b3   :  { %v1005_v14 = vadd.f32 %v1004_v49, %v1003_v53 }
 0x2b5   :  { %v1007_v30 = vadd.f32 %v1006_v21, %v1005_v14 }
 0x2b6   :  { %v930_v41 = vpop.xlane.xlu0 %929  ;;  %v933_v6 = vpop.xlane.xlu1 %932 }
 0x2b7   :  { %v927_v62 = vpop.xlane.xlu2 %926  ;;  %v1010_v29 = vsel %vm664_vm11, %v930_v41, 0.0  ;;  %v1012_v12 = vsel %vm664_vm11, %v933_v6, 0.0 }
 0x2b8   :  { %v1008_v3 = vsel %vm664_vm11, %v927_v62, 0.0 }
 0x2b9   :  { %v1009_v18 = vadd.f32 %v1008_v3, %v1007_v30 }
 0x2bb   :  { %v1011_v51 = vadd.f32 %v1010_v29, %v1009_v18 }
 0x2bd   :  { %v1013_v60 = vadd.f32 %v1012_v12, %v1011_v51 }
 0x2bf   :  { %v936_v9 = vpop.xlane.xlu2 %935 }
 0x2c0   :  { %v1014_v17 = vsel %vm664_vm11, %v936_v9, 0.0 }
 0x2c1   :  { %v1015_v19 = vadd.f32 %v1014_v17, %v1013_v60 }
 0x2c2   :  { %v942_v7 = vpop.xlane.xlu1 %941  ;;  %v939_v4 = vpop.xlane.xlu0 %938 }
 0x2c3   :  { %v1047_v58 = vmul.f32 0.00048828125, %v1015_v19  ;;  %v1017_v2 = vsel %vm664_vm11, %v942_v7, 0.0  ;;  %v1016_v53 = vsel %vm664_vm11, %v939_v4, 0.0 }
 0x2c4   :  { %v1018_v14 = vadd.f32 %v1017_v2, %v1016_v53 }
 0x2c5   :  { %v1049_v63 = vadd.f32 1e-05, %v1047_v58 }
 0x2c7   :  { %1977 = vrsqrt.f32 %v1049_v63  ;;  %v945_v49 = vpop.xlane.xlu2 %944  ;;  %vm1057_vm13 = vweird.f32 %v1049_v63 }
 0x2c8   :  { %v1019_v21 = vsel %vm664_vm11, %v945_v49, 0.0 }
 0x2c9   :  { %v1020_v62 = vadd.f32 %v1019_v21, %v1018_v14 }
 0x2ca   :  { %v951_v30 = vpop.xlane.xlu1 %950  ;;  %v948_v41 = vpop.xlane.xlu0 %947 }
 0x2cb   :  { %v1021_v3 = vsel %vm664_vm11, %v948_v41, 0.0  ;;  %v1023_v29 = vsel %vm664_vm11, %v951_v30, 0.0 }
 0x2cc   :  { %v1022_v18 = vadd.f32 %v1021_v3, %v1020_v62 }
 0x2cd   :  { %v1978_v6 = vpop.eup %1977 }
 0x2ce   :  { %v1052_v11 = vmul.f32 %v1978_v6, %v1049_v63  ;;  %v1024_v51 = vadd.f32 %v1023_v29, %v1022_v18  ;;  %vm1058_vm12 = vweird.f32 %v1978_v6  ;;  %v3553_v29 = vperm.slane %v2190_v27, 0 }
 0x2cf   :  { %v954_v12 = vpop.xlane.xlu2 %953  ;;  %vm1059_vm14 = vmor %vm1057_vm13, %vm1058_vm12 }
 0x2d0   :  { %v1053_v9 = vmul.f32 %v1978_v6, %v1052_v11  ;;  %v1025_v60 = vsel %vm664_vm11, %v954_v12, 0.0 }
 0x2d1   :  { %v1026_v19 = vadd.f32 %v1025_v60, %v1024_v51 }
 0x2d2   :  { %v1054_v17 = vmul.f32 0.5, %v1053_v9  ;;  %v960_v7 = vpop.xlane.xlu1 %959  ;;  %v957_v4 = vpop.xlane.xlu0 %956 }
 0x2d3   :  { %v1027_v58 = vsel %vm664_vm11, %v957_v4, 0.0  ;;  %v1029_v49 = vsel %vm664_vm11, %v960_v7, 0.0 }
 0x2d4   :  { %v1055_v2 = vsub.f32 1.5, %v1054_v17  ;;  %v1028_v53 = vadd.f32 %v1027_v58, %v1026_v19 }
 0x2d6   :  { %v1056_v14 = vmul.f32 %v1978_v6, %v1055_v2  ;;  %v1030_v21 = vadd.f32 %v1029_v49, %v1028_v53 }
 0x2d7   :  { %v963_v62 = vpop.xlane.xlu2 %962 }
 0x2d8   :  { %v3219_v30 = vsel %vm1059_vm14, %v1978_v6, %v1056_v14  ;;  %v1031_v41 = vsel %vm664_vm11, %v963_v62, 0.0 }
 0x2d9   :  { %v1137_v3 = vmul.f32 %v2223_v39, %v3219_v30  ;;  %v1136_v18 = vmul.f32 %v2270_v59, %v3219_v30  ;;  %v1135_v11 = vmul.f32 %v3553_v29, %v3219_v30  ;;  %v1032_v51 = vadd.f32 %v1031_v41, %v1030_v21  ;;  %v3554_v41 = vld [vmem:[#allocation13_spill] sm:$0xff] }
 0x2da   :  { %v969_v12 = vpop.xlane.xlu1 %968  ;;  %v966_v63 = vpop.xlane.xlu0 %965  ;;  %v1144_v59 = vmul.f32 %v2324_v37, %v3219_v30  ;;  %v1139_v27 = vmul.f32 %v2243_v48, %v3219_v30  ;;  %v1138_v58 = vmul.f32 %v2233_v44, %v3219_v30  ;;  %v1147_v48 = vmul.f32 %v2380_v50, %v3219_v30 }
 0x2db   :  { %1179 = vperm.xlu0 %1973, %v1137_v3   ;;  %1174 = vperm.xlu2 %1972, %v1136_v18   ;;  %v1033_v6 = vsel %vm664_vm11, %v966_v63, 0.0  ;;  %v1035_v60 = vsel %vm664_vm11, %v969_v12, 0.0  ;;  %v1141_v3 = vmul.f32 %v3554_v41, %v3219_v30  ;;  %v3555_v18 = vld [vmem:[#allocation10_spill] sm:$0xff]  ;;  %v3556_v50 = vperm.slane %v2240_v47, 0 }
 0x2dc   :  { %1169 = vperm.xlu1 %1971, %v1135_v11   ;;  %v1034_v9 = vadd.f32 %v1033_v6, %v1032_v51  ;;  %v1140_v29 = vmul.f32 %v3555_v18, %v3219_v30  ;;  %v3564_v18 = vld [vmem:[#allocation9_spill] sm:$0xff] }
 0x2de   :  { %v1036_v17 = vadd.f32 %v1035_v60, %v1034_v9  ;;  %v1150_v9 = vmul.f32 %v2471_v46, %v3219_v30  ;;  %v1143_v60 = vmul.f32 %v3556_v50, %v3219_v30  ;;  %v3569_v50 = vld [vmem:[#allocation8_spill] sm:$0xff] }
 0x2df   :  { %v972_v39 = vpop.xlane.xlu2 %971 }
 0x2e0   :  { %v1037_v19 = vsel %vm664_vm11, %v972_v39, 0.0 }
 0x2e1   :  { %v1038_v7 = vadd.f32 %v1037_v19, %v1036_v17  ;;  %v3557_v17 = vld [vmem:[#allocation11_spill] sm:$0xff] }
 0x2e2   :  { %v978_v4 = vpop.xlane.xlu1 %977  ;;  %v975_v2 = vpop.xlane.xlu0 %974  ;;  %v1142_v39 = vmul.f32 %v3557_v17, %v3219_v30 }
 0x2e3   :  { %1214 = vperm.xlu0 %1973, %v1144_v59   ;;  %1189 = vperm.xlu2 %1972, %v1139_v27   ;;  %v1039_v53 = vsel %vm664_vm11, %v975_v2, 0.0  ;;  %v1041_v14 = vsel %vm664_vm11, %v978_v4, 0.0  ;;  %v3558_v27 = vld [vmem:[#allocation14_spill] sm:$0xff]  ;;  %v3559_v4 = vld [vmem:[#allocation12_spill] sm:$0xff] }
 0x2e4   :  { %1184 = vperm.xlu1 %1971, %v1138_v58   ;;  %v1040_v49 = vadd.f32 %v1039_v53, %v1038_v7  ;;  %v1146_v7 = vmul.f32 %v3558_v27, %v3219_v30  ;;  %v1145_v58 = vmul.f32 %v3559_v4, %v3219_v30 }
 0x2e6   :  { %v1042_v21 = vadd.f32 %v1041_v14, %v1040_v49  ;;  %v3560_v49 = vld [vmem:[#allocation16_spill] sm:$0xff] }
 0x2e7   :  { %v981_v62 = vpop.xlane.xlu2 %980  ;;  %v1149_v14 = vmul.f32 %v3560_v49, %v3219_v30 }
 0x2e8   :  { %v1043_v37 = vsel %vm664_vm11, %v981_v62, 0.0 }
 0x2e9   :  { %v1044_v44 = vadd.f32 %v1043_v37, %v1042_v21  ;;  %v3561_v21 = vld [vmem:[#allocation15_spill] sm:$0xff] }
 0x2ea   :  { %v984_v11 = vpop.xlane.xlu0 %983  ;;  %v1148_v62 = vmul.f32 %v3561_v21, %v3219_v30 }
 0x2eb   :  { %1229 = vperm.xlu0 %1973, %v1147_v48   ;;  %1199 = vperm.xlu2 %1972, %v1141_v3   ;;  %v1045_v51 = vsel %vm664_vm11, %v984_v11, 0.0  ;;  %v3562_v48 = vld [vmem:[#allocation21_spill] sm:$0xff] }
 0x2ec   :  { %1194 = vperm.xlu1 %1971, %v1140_v29   ;;  %v1046_v12 = vadd.f32 %v1045_v51, %v1044_v44  ;;  %v3563_v3 = vld [vmem:[#allocation17_spill] sm:$0xff]  ;;  %v3565_v29 = vperm.slane %v3564_v18, 0  ;;  %v3566_v51 = vld [vmem:[#allocation24_spill] sm:$0xff] }
 0x2ee   :  { %v1048_v63 = vmul.f32 0.00048828125, %v1046_v12 }
 0x2f0   :  { %v1050_v6 = vadd.f32 1e-05, %v1048_v63  ;;  %v3567_v63 = vld [vmem:[#allocation19_spill] sm:$0xff] }
 0x2f2   :  { %1979 = vrsqrt.f32 %v1050_v6  ;;  %vm1067_vm0 = vweird.f32 %v1050_v6 }
 0x2f3   :  { %1244 = vperm.xlu0 %1973, %v1150_v9   ;;  %1209 = vperm.xlu2 %1972, %v1143_v60   ;;  %v3568_v9 = vld [vmem:[#allocation18_spill] sm:$0xff]  ;;  %v3570_v60 = vperm.slane %v3569_v50, 0 }
 0x2f4   :  { %1204 = vperm.xlu1 %1971, %v1142_v39   ;;  %v3571_v39 = vld [vmem:[#allocation22_spill] sm:$0xff] }
 0x2f8   :  { %v1980_v19 = vpop.eup %1979 }
 0x2f9   :  { %v1062_v59 = vmul.f32 %v1980_v19, %v1050_v6  ;;  %vm1068_vm15 = vweird.f32 %v1980_v19 }
 0x2fa   :  { %vm1069_vm1 = vmor %vm1067_vm0, %vm1068_vm15 }
 0x2fb   :  { %v1063_v46 = vmul.f32 %v1980_v19, %v1062_v59  ;;  %1224 = vperm.xlu2 %1972, %v1146_v7   ;;  %v3572_v59 = vld [vmem:[#allocation20_spill] sm:$0xff]  ;;  %v1981_v7 = vld [vmem:[%s3452_s2 + $0x18] sm:$0xff]  ;;  %s2060_s2 = smov [#allocation5]  }
 0x2fc   :  { %1219 = vperm.xlu1 %1971, %v1145_v58   ;;  %v80_v4 = vrot.slane %v1981_v7, 1  ;;  %v3573_v58 = vld [vmem:[#allocation23_spill] sm:$0xff]  ;;  %v84_v49 = vrot.slane %v1981_v7, 5  ;;  %v83_v21 = vrot.slane %v1981_v7, 4  ;;  %s1891_s10 = sshll.u32 %s2060_s2, 4  ;;  %s1892_s10 = int_to_ptr.vmem [resolvable:$true] %s1891_s10 }
 0x2fd   :  { %v1064_v47 = vmul.f32 0.5, %v1063_v46 }
 0x2ff   :  { %v1065_v2 = vsub.f32 1.5, %v1064_v47  ;;  %v1096_v47 = vperm.slane %v80_v4, 0 }
 0x301   :  { %v1066_v53 = vmul.f32 %v1980_v19, %v1065_v2  ;;  %v3574_v2 = vld [vmem:[#allocation26_spill] sm:$0xff] }
 0x303   :  { %v1070_v37 = vsel %vm1069_vm1, %v1980_v19, %v1066_v53  ;;  %1239 = vperm.xlu2 %1972, %v1149_v14  }
 0x304   :  { %1234 = vperm.xlu1 %1971, %v1148_v62   ;;  %v1153_v41 = vmul.f32 %v3562_v48, %v1070_v37  ;;  %v1152_v44 = vmul.f32 %v3563_v3, %v1070_v37  ;;  %v1151_v11 = vmul.f32 %v3565_v29, %v1070_v37  ;;  %v1156_v12 = vmul.f32 %v3566_v51, %v1070_v37  ;;  %v3575_v62 = vld [vmem:[#allocation25_spill] sm:$0xff] }
 0x305   :  { %v1155_v6 = vmul.f32 %v3567_v63, %v1070_v37  ;;  %v1154_v30 = vmul.f32 %v3568_v9, %v1070_v37  ;;  %v1159_v17 = vmul.f32 %v3570_v60, %v1070_v37  ;;  %v1158_v19 = vmul.f32 %v3571_v39, %v1070_v37  ;;  %v3578_v39 = vld [vmem:[#allocation30_spill] sm:$0xff] }
 0x306   :  { %1259 = vperm.xlu0 %1973, %v1153_v41   ;;  %v1157_v27 = vmul.f32 %v3572_v59, %v1070_v37  ;;  %v1162_v46 = vmul.f32 %v3573_v58, %v1070_v37  ;;  %v1161_v53 = vmul.f32 %v3574_v2, %v1070_v37  ;;  %v1160_v14 = vmul.f32 %v1096_v47, %v1070_v37 }
 0x307   :  { %v1165_v48 = vmul.f32 %v3575_v62, %v1070_v37  ;;  %v1100_v41 = vperm.slane %v84_v49, 0  ;;  %v1099_v3 = vperm.slane %v83_v21, 0  ;;  %v3576_v29 = vmov 2   ;;  %v3582_v62 = vld [vmem:[#allocation31_spill] sm:$0xff] }
 0x309   :  { %v1163_v18 = vmul.f32 %v1099_v3, %v1070_v37 }
 0x30b   :  { %1254 = vperm.xlu2 %1972, %v1152_v44   ;;  %v1164_v44 = vmul.f32 %v1100_v41, %v1070_v37 }
 0x30c   :  { %1249 = vperm.xlu1 %1971, %v1151_v11   ;;  %v3577_v11 = vld [vmem:[#allocation27_spill] sm:$0xff] }
 0x30d   :  { %v1166_v51 = vmul.f32 %v3577_v11, %v1070_v37 }
 0x30e   :  { %1274 = vperm.xlu0 %1973, %v1156_v12  }
 0x313   :  { %1269 = vperm.xlu2 %1972, %v1155_v6  }
 0x314   :  { %1264 = vperm.xlu1 %1971, %v1154_v30  }
 0x316   :  { %1289 = vperm.xlu0 %1973, %v1159_v17  }
 0x31b   :  { %1284 = vperm.xlu2 %1972, %v1158_v19  }
 0x31c   :  { %1279 = vperm.xlu1 %1971, %v1157_v27   ;;  %v3579_v27 = vld [vmem:[#allocation35_spill] sm:$0xff] }
 0x31e   :  { %1304 = vperm.xlu0 %1973, %v1162_v46  }
 0x323   :  { %1299 = vperm.xlu2 %1972, %v1161_v53  }
 0x324   :  { %1294 = vperm.xlu1 %1971, %v1160_v14  }
 0x326   :  { %1319 = vperm.xlu0 %1973, %v1165_v48  }
 0x32b   :  { %1314 = vperm.xlu2 %1972, %v1164_v44  }
 0x32c   :  { %1309 = vperm.xlu1 %1971, %v1163_v18  }
 0x32e   :  { %1975 = vset.pattern.permute.xlu0 %v3576_v29 }
 0x32f   :  { %1472 = vperm.xlu0 %1975, %v1099_v3  }
 0x333   :  { %1974 = vset.pattern.permute.xlu2 %v3576_v29 }
 0x334   :  { %1324 = vperm.xlu1 %1971, %v1166_v51   ;;  %1460 = vperm.xlu2 %1974, %v1096_v47  }
 0x335   :  { %v1175_v12 = vpop.permute.xlu2 %1174 }
 0x336   :  { %v1328_v59 = vmul.f32 %v1175_v12, %v2967_v25 }
 0x33c   :  { %1976 = vset.pattern.permute.xlu1 %v3576_v29 }
 0x33d   :  { %1476 = vperm.xlu1 %1976, %v1100_v41   ;;  %v1190_v63 = vpop.permute.xlu2 %1189  ;;  %v3583_v41 = vld [vmem:[#allocation33_spill] sm:$0xff] }
 0x33e   :  { %v1331_v2 = vmul.f32 %v1190_v63, %v2988_v15 }
 0x345   :  { %v1200_v6 = vpop.permute.xlu2 %1199 }
 0x346   :  { %v1333_v17 = vmul.f32 %v1200_v6, %v3020_v22  ;;  %v3581_v22 = vld [vmem:[#allocation32_spill] sm:$0xff] }
 0x347   :  { %v1488_v14 = vadd.f32 %v3581_v22, %v1328_v59 }
 0x348   :  { %v1493_v7 = vadd.f32 %v3579_v27, %v1333_v17 }
 0x349   :  { %v1552_v18 = vmul.f32 0.01, %v1488_v14  ;;  %vm1520_vm5 = vcmp.gt.f32.partialorder %v1488_v14, 0.0 }
 0x34a   :  { %v1557_v21 = vmul.f32 0.01, %v1493_v7  ;;  %vm1525_vm3 = vcmp.gt.f32.partialorder %v1493_v7, 0.0 }
 0x34c   :  { %v1589_v15 = vsel %vm1525_vm3, %v1493_v7, %v1557_v21  ;;  %v3588_v21 = vld [vmem:[#allocation37_spill] sm:$0xff] }
 0x34d   :  { %v1210_v9 = vpop.permute.xlu2 %1209  ;;  %v1180_v30 = vpop.permute.xlu0 %1179  ;;  %v1627_v17 = vrot.slane %v1589_v15, 4  ;;  %v3590_v15 = vld [vmem:[#allocation36_spill] sm:$0xff] }
 0x34e   :  { %v1170_v50 = vpop.permute.xlu1 %1169  ;;  %v1329_v60 = vmul.f32 %v1180_v30, %v2963_v45  ;;  %v3580_v45 = vld [vmem:[#allocation34_spill] sm:$0xff]  ;;  %v3584_v30 = vld [vmem:[#allocation43_spill] sm:$0xff] }
 0x34f   :  { %v1327_v4 = vmul.f32 %v1170_v50, %v2971_v55  ;;  %v1491_v55 = vadd.f32 %v3583_v41, %v1331_v2  ;;  %v1335_v2 = vmul.f32 %v1210_v9, %v3008_v42 }
 0x350   :  { %v1489_v19 = vadd.f32 %v3578_v39, %v1329_v60 }
 0x351   :  { %v1487_v48 = vadd.f32 %v3582_v62, %v1327_v4  ;;  %v1555_v6 = vmul.f32 0.01, %v1491_v55  ;;  %vm1523_vm7 = vcmp.gt.f32.partialorder %v1491_v55, 0.0 }
 0x352   :  { %v1553_v53 = vmul.f32 0.01, %v1489_v19  ;;  %vm1521_vm2 = vcmp.gt.f32.partialorder %v1489_v19, 0.0 }
 0x353   :  { %v1551_v29 = vmul.f32 0.01, %v1487_v48  ;;  %vm1519_vm6 = vcmp.gt.f32.partialorder %v1487_v48, 0.0  ;;  %v1587_v4 = vsel %vm1523_vm7, %v1491_v55, %v1555_v6 }
 0x354   :  { %v1585_v3 = vsel %vm1521_vm2, %v1489_v19, %v1553_v53  ;;  %v1584_v19 = vsel %vm1520_vm5, %v1488_v14, %v1552_v18  ;;  %v3585_v53 = vld [vmem:[#allocation38_spill] sm:$0xff] }
 0x355   :  { %v1225_v37 = vpop.permute.xlu2 %1224  ;;  %v1215_v46 = vpop.permute.xlu0 %1214  ;;  %v1615_v12 = vrot.slane %v1585_v3, 4  ;;  %v1983_v3 = vld [vmem:[#allocation2] sm:$0xff] }
 0x356   :  { %v1185_v58 = vpop.permute.xlu1 %1184  ;;  %v1338_v44 = vmul.f32 %v1225_v37, %v3037_v36  ;;  %v1336_v39 = vmul.f32 %v1215_v46, %v3048_v43  ;;  %v1583_v36 = vsel %vm1519_vm6, %v1487_v48, %v1551_v29  ;;  %v3586_v43 = vld [vmem:[#allocation28_spill] sm:$0xff]  ;;  %v1982_v48 = vld [vmem:[#allocation2 + $0x8] sm:$0xff] }
 0x357   :  { %v1330_v47 = vmul.f32 %v1185_v58, %v2992_v35  ;;  %v1616_v59 = vsel %vm440_vm10, %v1615_v12, %v1583_v36 }
 0x358   :  { %v1498_v50 = vadd.f32 %v3584_v30, %v1338_v44  ;;  %v1620_v46 = vperm.slane %v1616_v59, %v3586_v43  ;;  %v3317_v44 = vmul.f32 2.0, %v1983_v3 }
 0x359   :  { %v1490_v49 = vadd.f32 %v3580_v45, %v1330_v47  ;;  %v1628_v47 = vsel %vm440_vm10, %v1627_v17, %v1587_v4  ;;  %v1496_v45 = vadd.f32 %v3585_v53, %v1336_v39 }
 0x35a   :  { %v1562_v58 = vmul.f32 0.01, %v1498_v50  ;;  %vm1530_vm8 = vcmp.gt.f32.partialorder %v1498_v50, 0.0  ;;  %v1632_v41 = vperm.slane %v1628_v47, %v3586_v43 }
 0x35b   :  { %vm1522_vm4 = vcmp.gt.f32.partialorder %v1490_v49, 0.0  ;;  %v1554_v25 = vmul.f32 0.01, %v1490_v49  ;;  %vm1528_vm9 = vcmp.gt.f32.partialorder %v1496_v45, 0.0 }
 0x35c   :  { %v1594_v42 = vsel %vm1530_vm8, %v1498_v50, %v1562_v58 }
 0x35d   :  { %v1586_v35 = vsel %vm1522_vm4, %v1490_v49, %v1554_v25  ;;  %v1240_v11 = vpop.permute.xlu2 %1239  ;;  %v1230_v60 = vpop.permute.xlu0 %1229  ;;  %v3311_v25 = vmul.f32 2.0, %v1982_v48  ;;  %v1677_v6 = vrot.slane %v1594_v42, 4  ;;  %v3594_v48 = vld [vmem:[#allocation39_spill] sm:$0xff] }
 0x35e   :  { %v1195_v51 = vpop.permute.xlu1 %1194  ;;  %v1621_v63 = vrot.slane %v1586_v35, 4  ;;  %v1341_v37 = vmul.f32 %v1240_v11, %v3061_v61  ;;  %v3587_v61 = vld [vmem:[#allocation46_spill] sm:$0xff]  ;;  %v1339_v9 = vmul.f32 %v1230_v60, %v3073_v38  ;;  %v3589_v35 = vld [vmem:[#allocation40_spill] sm:$0xff]  ;;  %v1641_v11 = vrot.slane %v1620_v46, 4  ;;  %v3591_v60 = vld [vmem:[#allocation41_spill] sm:$0xff] }
 0x35f   :  { %v1332_v7 = vmul.f32 %v1195_v51, %v2981_v10  ;;  %v1495_v18 = vadd.f32 %v3589_v35, %v1335_v2  ;;  %v1560_v51 = vmul.f32 0.01, %v1496_v45  ;;  %v1653_v38 = vrot.slane %v1632_v41, 4 }
 0x360   :  { %v1622_v27 = vsel %vm440_vm10, %v1621_v63, %v1584_v19  ;;  %v1501_v22 = vadd.f32 %v3587_v61, %v1341_v37  ;;  %v1499_v17 = vadd.f32 %v3591_v60, %v1339_v9  ;;  %v3592_v61 = vld [vmem:[#allocation29_spill] sm:$0xff]  ;;  %v1984_v9 = vld [vmem:[#allocation2 + $0x10] sm:$0xff] }
 0x361   :  { %v1626_v49 = vperm.slane %v1622_v27, %v3586_v43  ;;  %v1492_v62 = vadd.f32 %v3588_v21, %v1332_v7  ;;  %vm1527_vm14 = vcmp.gt.f32.partialorder %v1495_v18, 0.0  ;;  %v1559_v37 = vmul.f32 0.01, %v1495_v18 }
 0x362   :  { %v1565_v12 = vmul.f32 0.01, %v1501_v22  ;;  %vm1533_vm12 = vcmp.gt.f32.partialorder %v1501_v22, 0.0  ;;  %v1592_v27 = vsel %vm1528_vm9, %v1496_v45, %v1560_v51  ;;  %vm1531_vm15 = vcmp.gt.f32.partialorder %v1499_v17, 0.0 }
 0x363   :  { %v1556_v30 = vmul.f32 0.01, %v1492_v62  ;;  %vm1524_vm13 = vcmp.gt.f32.partialorder %v1492_v62, 0.0  ;;  %v1642_v39 = vsel %vm440_vm10, %v1626_v49, %v1641_v11  ;;  %v1678_v58 = vsel %vm440_vm10, %v1677_v6, %v1592_v27 }
 0x364   :  { %v1597_v47 = vsel %vm1533_vm12, %v1501_v22, %v1565_v12  ;;  %v1841_v3 = vmul.f32 2.0, %v1984_v9  ;;  %v1985_v22 = vld [vmem:[#allocation2 + $0x18] sm:$0xff]  ;;  %v1682_v12 = vperm.slane %v1678_v58, %v3586_v43 }
 0x365   :  { %v3315_v55 = vpop.permute.xlu2 %1254  ;;  %v1245_v63 = vpop.permute.xlu0 %1244  ;;  %v1588_v2 = vsel %vm1524_vm13, %v1492_v62, %v1556_v30  ;;  %v1842_v62 = vmul.f32 2.0, %v1985_v22  ;;  %v1683_v35 = vrot.slane %v1597_v47, 4 }
 0x366   :  { %v1205_v14 = vpop.permute.xlu1 %1204  ;;  %v1342_v36 = vmul.f32 %v1245_v63, %v3092_v57 }
 0x367   :  { %v1334_v10 = vmul.f32 %v1205_v14, %v3014_v26  ;;  %v1639_v26 = vrot.slane %v1626_v49, 4  ;;  %v1650_v14 = vperm.slane %v1642_v39, %v3592_v61  ;;  %v1563_v49 = vmul.f32 0.01, %v1499_v17 }
 0x369   :  { %v1494_v29 = vadd.f32 %v3590_v15, %v1334_v10  ;;  %v1640_v59 = vsel %vm440_vm10, %v1639_v26, %v1620_v46  ;;  %v3593_v10 = vld [vmem:[#allocation44_spill] sm:$0xff]  ;;  %v1669_v51 = vrot.slane %v1650_v14, 4  ;;  %v1595_v63 = vsel %vm1531_vm15, %v1499_v17, %v1563_v49 }
 0x36a   :  { %v1646_v57 = vperm.slane %v1640_v59, %v3592_v61  ;;  %v1502_v45 = vadd.f32 %v3593_v10, %v1342_v36  ;;  %v1684_v59 = vsel %vm440_vm10, %v1683_v35, %v1595_v63  ;;  %v1695_v10 = vrot.slane %v1682_v12, 4 }
 0x36b   :  { %vm1526_vm11 = vcmp.gt.f32.partialorder %v1494_v29, 0.0  ;;  %v1558_v50 = vmul.f32 0.01, %v1494_v29 }
 0x36c   :  { %v1665_v30 = vrot.slane %v1646_v57, 4  ;;  %v1566_v60 = vmul.f32 0.01, %v1502_v45  ;;  %vm1534_vm1 = vcmp.gt.f32.partialorder %v1502_v45, 0.0 }
 0x36d   :  { %v1590_v19 = vsel %vm1526_vm11, %v1494_v29, %v1558_v50  ;;  %v3335_v15 = vpop.permute.xlu2 %1269 }
 0x36e   :  { %v1633_v7 = vrot.slane %v1590_v19, 4  ;;  %v1220_v4 = vpop.permute.xlu1 %1219 }
 0x36f   :  { %v1337_v53 = vmul.f32 %v1220_v4, %v3041_v8  ;;  %v1591_v8 = vsel %vm1527_vm14, %v1495_v18, %v1559_v37 }
 0x370   :  { %v1634_v21 = vsel %vm440_vm10, %v1633_v7, %v1588_v2 }
 0x371   :  { %v1638_v46 = vperm.slane %v1634_v21, %v3586_v43  ;;  %v1497_v42 = vadd.f32 %v3594_v48, %v1337_v53  ;;  %v3595_v21 = vld [vmem:[#allocation42_spill] sm:$0xff] }
 0x373   :  { %v1651_v29 = vrot.slane %v1638_v46, 4  ;;  %v1654_v11 = vsel %vm440_vm10, %v1638_v46, %v1653_v38  ;;  %vm1529_vm0 = vcmp.gt.f32.partialorder %v1497_v42, 0.0  ;;  %v1561_v26 = vmul.f32 0.01, %v1497_v42 }
 0x374   :  { %v1662_v6 = vperm.slane %v1654_v11, %v3592_v61 }
 0x375   :  { %v1652_v50 = vsel %vm440_vm10, %v1651_v29, %v1632_v41  ;;  %v1593_v18 = vsel %vm1529_vm0, %v1497_v42, %v1561_v26  ;;  %v1688_v42 = vperm.slane %v1684_v59, %v3586_v43  ;;  %v1344_v59 = vmul.f32 %v3315_v55, %v3099_v1 }
 0x376   :  { %v1658_v39 = vperm.slane %v1652_v50, %v3592_v61  ;;  %v1667_v19 = vrot.slane %v1662_v6, 4  ;;  %v1670_v36 = vsel %vm440_vm10, %v1662_v6, %v1669_v51  ;;  %v1671_v38 = vrot.slane %v1593_v18, 4  ;;  %v1235_v37 = vpop.permute.xlu1 %1234  ;;  %v1987_v18 = vld [vmem:[#allocation2 + $0x30] sm:$0xff] }
 0x377   :  { %v1858_v27 = vadd.f32 %v1842_v62, %v1670_v36  ;;  %v1340_v17 = vmul.f32 %v1235_v37, %v3067_v20  ;;  %v1598_v20 = vsel %vm1534_vm1, %v1502_v45, %v1566_v60  ;;  %v1709_v29 = vrot.slane %v1688_v42, 4  ;;  %v1986_v60 = vld [vmem:[#allocation2 + $0x28] sm:$0xff] }
 0x378   :  { %v1663_v7 = vrot.slane %v1658_v39, 4  ;;  %v1666_v4 = vsel %vm440_vm10, %v1658_v39, %v1665_v30  ;;  %v1668_v41 = vsel %vm440_vm10, %v1667_v19, %v1650_v14  ;;  %v1672_v58 = vsel %vm440_vm10, %v1671_v38, %v1591_v8  ;;  %v1260_v47 = vpop.permute.xlu0 %1259  ;;  %v1988_v19 = vld [vmem:[#allocation2 + $0x38] sm:$0xff] }
 0x379   :  { %v1856_v2 = vadd.f32 %v3311_v25, %v1666_v4  ;;  %v1857_v53 = vadd.f32 %v1841_v3, %v1668_v41  ;;  %1874 = vst [vmem:[#allocation5 + $0x18] sm:$0xff] %v1858_v27  ;;  %v1676_v49 = vperm.slane %v1672_v58, %v3586_v43  ;;  %v1500_v46 = vadd.f32 %v3595_v21, %v1340_v17  ;;  %v1285_v25 = vpop.permute.xlu2 %1284  ;;  %v3598_v58 = vld [vmem:[#allocation55_spill] sm:$0xff] }
 0x37a   :  { %v1664_v48 = vsel %vm440_vm10, %v1663_v7, %v1646_v57  ;;  %v1345_v3 = vmul.f32 %v1260_v47, %v3106_v54  ;;  %v1689_v62 = vrot.slane %v1598_v20, 4  ;;  %v1350_v26 = vmul.f32 %v1285_v25, %v3133_v52  ;;  %v3596_v54 = vld [vmem:[#allocation47_spill] sm:$0xff]  ;;  %v3597_v7 = vld [vmem:[#allocation45_spill] sm:$0xff] }
 0x37b   :  { %v1855_v9 = vadd.f32 %v3317_v44, %v1664_v48  ;;  %1872 = vst [vmem:[#allocation5 + $0x8] sm:$0xff] %v1856_v2  ;;  %v1697_v14 = vrot.slane %v1676_v49, 4  ;;  %vm1532_vm2 = vcmp.gt.f32.partialorder %v1500_v46, 0.0  ;;  %v1564_v22 = vmul.f32 0.01, %v1500_v46 }
 0x37c   :  { %1873 = vst [vmem:[#allocation5 + $0x10] sm:$0xff] %v1857_v53  ;;  %v1696_v8 = vsel %vm440_vm10, %v1695_v10, %v1676_v49  ;;  %v1505_v6 = vadd.f32 %v3596_v54, %v1345_v3  ;;  %v1845_v39 = vmul.f32 2.0, %v1987_v18  ;;  %v1846_v36 = vmul.f32 2.0, %v1988_v19  ;;  %v3599_v10 = vld [vmem:[#allocation50_spill] sm:$0xff] }
 0x37d   :  { %1871 = vst [vmem:[#allocation5] sm:$0xff] %v1855_v9  ;;  %v1698_v35 = vsel %vm440_vm10, %v1682_v12, %v1697_v14  ;;  %v1596_v57 = vsel %vm1532_vm2, %v1500_v46, %v1564_v22  ;;  %v1702_v51 = vperm.slane %v1696_v8, %v3592_v61  ;;  %v1844_v12 = vmul.f32 2.0, %v1986_v60  ;;  %v3600_v22 = vld [vmem:[#allocation49_spill] sm:$0xff] }
 0x37e   :  { %v1250_v45 = vpop.permute.xlu1 %1249  ;;  %v1706_v11 = vperm.slane %v1698_v35, %v3592_v61  ;;  %v1690_v44 = vsel %vm440_vm10, %v1689_v62, %v1596_v57  ;;  %v1510_v47 = vadd.f32 %v3598_v58, %v1350_v26  ;;  %v1569_v2 = vmul.f32 0.01, %v1505_v6 }
 0x37f   :  { %v1694_v63 = vperm.slane %v1690_v44, %v3586_v43  ;;  %v1343_v30 = vmul.f32 %v1250_v45, %v3102_v33  ;;  %v1721_v4 = vrot.slane %v1702_v51, 4  ;;  %vm1537_vm3 = vcmp.gt.f32.partialorder %v1505_v6, 0.0 }
 0x380   :  { %v1275_v50 = vpop.permute.xlu0 %1274  ;;  %v1725_v27 = vrot.slane %v1706_v11, 4  ;;  %v1504_v25 = vadd.f32 %v3600_v22, %v1344_v59  ;;  %v1601_v8 = vsel %vm1537_vm3, %v1505_v6, %v1569_v2  ;;  %vm1542_vm5 = vcmp.gt.f32.partialorder %v1510_v47, 0.0 }
 0x381   :  { %v1707_v38 = vrot.slane %v1694_v63, 4  ;;  %v1710_v37 = vsel %vm440_vm10, %v1694_v63, %v1709_v29  ;;  %v1348_v52 = vmul.f32 %v1275_v50, %v3128_v13  ;;  %v1503_v33 = vadd.f32 %v3597_v7, %v1343_v30  ;;  %v1989_v13 = vld [vmem:[#allocation2 + $0x20] sm:$0xff]  ;;  %v1300_v35 = vpop.permute.xlu2 %1299 }
 0x382   :  { %v1718_v17 = vperm.slane %v1710_v37, %v3592_v61  ;;  %v1843_v46 = vmul.f32 2.0, %v1989_v13  ;;  %v1574_v29 = vmul.f32 0.01, %v1510_v47  ;;  %v1727_v54 = vrot.slane %v1601_v8, 4  ;;  %v3601_v50 = vld [vmem:[#allocation48_spill] sm:$0xff] }
 0x383   :  { %v1708_v41 = vsel %vm440_vm10, %v1707_v38, %v1688_v42  ;;  %v1567_v55 = vmul.f32 0.01, %v1503_v33  ;;  %v1508_v48 = vadd.f32 %v3599_v10, %v1348_v52  ;;  %vm1535_vm4 = vcmp.gt.f32.partialorder %v1503_v33, 0.0 }
 0x384   :  { %v1714_v53 = vperm.slane %v1708_v41, %v3592_v61  ;;  %v1723_v49 = vrot.slane %v1718_v17, 4  ;;  %v1726_v21 = vsel %vm440_vm10, %v1718_v17, %v1725_v27  ;;  %v1568_v6 = vmul.f32 0.01, %v1504_v25  ;;  %v3603_v17 = vld [vmem:[#allocation51_spill] sm:$0xff] }
 0x385   :  { %v1862_v1 = vadd.f32 %v1846_v36, %v1726_v21  ;;  %v1599_v63 = vsel %vm1535_vm4, %v1503_v33, %v1567_v55  ;;  %v1572_v30 = vmul.f32 0.01, %v1508_v48  ;;  %vm1540_vm6 = vcmp.gt.f32.partialorder %v1508_v48, 0.0 }
 0x386   :  { %v1265_v20 = vpop.permute.xlu1 %1264  ;;  %v1719_v9 = vrot.slane %v1714_v53, 4  ;;  %v1722_v14 = vsel %vm440_vm10, %v1714_v53, %v1721_v4  ;;  %v1724_v42 = vsel %vm440_vm10, %v1723_v49, %v1706_v11  ;;  %v1347_v11 = vmul.f32 %v3335_v15, %v3115_v28 }
 0x387   :  { %v1860_v3 = vadd.f32 %v1844_v12, %v1722_v14  ;;  %v1861_v62 = vadd.f32 %v1845_v39, %v1724_v42  ;;  %1878 = vst [vmem:[#allocation5 + $0x38] sm:$0xff] %v1862_v1  ;;  %v1346_v44 = vmul.f32 %v1265_v20, %v3118_v24  ;;  %v1606_v12 = vsel %vm1542_vm5, %v1510_v47, %v1574_v29  ;;  %v3602_v39 = vld [vmem:[#allocation52_spill] sm:$0xff]  ;;  %v1991_v29 = vld [vmem:[#allocation2 + $0x48] sm:$0xff] }
 0x388   :  { %v1290_v57 = vpop.permute.xlu0 %1289  ;;  %v1720_v45 = vsel %vm440_vm10, %v1719_v9, %v1702_v51  ;;  %v1728_v51 = vsel %vm440_vm10, %v1727_v54, %v1599_v63  ;;  %vm1536_vm8 = vcmp.gt.f32.partialorder %v1504_v25, 0.0  ;;  %v1507_v19 = vadd.f32 %v3602_v39, %v1347_v11  ;;  %v1992_v11 = vld [vmem:[#allocation2 + $0x58] sm:$0xff] }
 0x389   :  { %v1859_v26 = vadd.f32 %v1843_v46, %v1720_v45  ;;  %1876 = vst [vmem:[#allocation5 + $0x28] sm:$0xff] %v1860_v3  ;;  %v1506_v60 = vadd.f32 %v3601_v50, %v1346_v44  ;;  %v1604_v36 = vsel %vm1540_vm6, %v1508_v48, %v1572_v30  ;;  %v1745_v15 = vrot.slane %v1606_v12, 4  ;;  %v3390_v4 = vpop.permute.xlu2 %1314  ;;  %v1990_v45 = vld [vmem:[#allocation2 + $0x40] sm:$0xff]  ;;  %v3605_v50 = vld [vmem:[#allocation54_spill] sm:$0xff]  ;;  %v3606_v12 = vld [vmem:[#allocation57_spill] sm:$0xff] }
 0x38a   :  { %1877 = vst [vmem:[#allocation5 + $0x30] sm:$0xff] %v1861_v62  ;;  %v1732_v37 = vperm.slane %v1728_v51, %v3586_v43  ;;  %v1600_v27 = vsel %vm1536_vm8, %v1504_v25, %v1568_v6  ;;  %v1571_v58 = vmul.f32 0.01, %v1507_v19  ;;  %vm1539_vm11 = vcmp.gt.f32.partialorder %v1507_v19, 0.0 }
 0x38b   :  { %1875 = vst [vmem:[#allocation5 + $0x20] sm:$0xff] %v1859_v26  ;;  %vm1538_vm7 = vcmp.gt.f32.partialorder %v1506_v60, 0.0  ;;  %v1570_v24 = vmul.f32 0.01, %v1506_v60  ;;  %v1746_v33 = vsel %vm440_vm10, %v1745_v15, %v1604_v36  ;;  %v1353_v10 = vmul.f32 %v1300_v35, %v3151_v34  ;;  %v3604_v26 = vld [vmem:[#allocation53_spill] sm:$0xff] }
 0x38c   :  { %v1750_v53 = vperm.slane %v1746_v33, %v3586_v43  ;;  %v1603_v55 = vsel %vm1539_vm11, %v1507_v19, %v1571_v58  ;;  %v1351_v9 = vmul.f32 %v1290_v57, %v3146_v32  ;;  %v1847_v34 = vmul.f32 2.0, %v1990_v45 }
 0x38d   :  { %v1602_v38 = vsel %vm1538_vm7, %v1506_v60, %v1570_v24  ;;  %v1848_v44 = vmul.f32 2.0, %v1991_v29  ;;  %v1513_v63 = vadd.f32 %v3604_v26, %v1353_v10 }
 0x38e   :  { %v1280_v18 = vpop.permute.xlu1 %1279  ;;  %v1733_v52 = vrot.slane %v1602_v38, 4  ;;  %v1763_v25 = vrot.slane %v1750_v53, 4 }
 0x38f   :  { %v1349_v28 = vmul.f32 %v1280_v18, %v3136_v40  ;;  %v1753_v40 = vrot.slane %v1732_v37, 4  ;;  %vm1545_vm12 = vcmp.gt.f32.partialorder %v1513_v63, 0.0 }
 0x390   :  { %v1305_v59 = vpop.permute.xlu0 %1304  ;;  %v1734_v41 = vsel %vm440_vm10, %v1733_v52, %v1600_v27 }
 0x391   :  { %v1509_v7 = vadd.f32 %v3603_v17, %v1349_v28  ;;  %v1738_v47 = vperm.slane %v1734_v41, %v3586_v43  ;;  %v1354_v42 = vmul.f32 %v1305_v59, %v3164_v31  ;;  %v1461_v35 = vpop.permute.xlu2 %1460  ;;  %v1850_v31 = vmul.f32 2.0, %v1992_v11  ;;  %v1993_v28 = vld [vmem:[#allocation2 + $0x50] sm:$0xff] }
 0x392   :  { %v1849_v15 = vmul.f32 2.0, %v1993_v28 }
 0x393   :  { %vm1541_vm9 = vcmp.gt.f32.partialorder %v1509_v7, 0.0  ;;  %v1573_v2 = vmul.f32 0.01, %v1509_v7  ;;  %v1751_v49 = vrot.slane %v1738_v47, 4  ;;  %v1754_v13 = vsel %vm440_vm10, %v1738_v47, %v1753_v40  ;;  %v3607_v40 = vld [vmem:[#allocation58_spill] sm:$0xff] }
 0x394   :  { %v1762_v3 = vperm.slane %v1754_v13, %v3592_v61  ;;  %v1514_v60 = vadd.f32 %v3605_v50, %v1354_v42 }
 0x395   :  { %v1605_v21 = vsel %vm1541_vm9, %v1509_v7, %v1573_v2  ;;  %v1752_v48 = vsel %vm440_vm10, %v1751_v49, %v1732_v37  ;;  %v1577_v37 = vmul.f32 0.01, %v1513_v63 }
 0x396   :  { %v1739_v46 = vrot.slane %v1605_v21, 4  ;;  %v1295_v1 = vpop.permute.xlu1 %1294  ;;  %v1758_v20 = vperm.slane %v1752_v48, %v3592_v61  ;;  %v1781_v6 = vrot.slane %v1762_v3, 4  ;;  %v1578_v7 = vmul.f32 0.01, %v1514_v60 }
 0x397   :  { %v1352_v8 = vmul.f32 %v1295_v1, %v3154_v0  ;;  %v1511_v0 = vadd.f32 %v3606_v12, %v1351_v9  ;;  %vm1546_vm13 = vcmp.gt.f32.partialorder %v1514_v60, 0.0  ;;  %v1609_v13 = vsel %vm1545_vm12, %v1513_v63, %v1577_v37 }
 0x398   :  { %v1740_v14 = vsel %vm440_vm10, %v1739_v46, %v1603_v55  ;;  %v1320_v22 = vpop.permute.xlu0 %1319  ;;  %v1777_v54 = vrot.slane %v1758_v20, 4  ;;  %v1610_v46 = vsel %vm1546_vm13, %v1514_v60, %v1578_v7  ;;  %v1783_v9 = vrot.slane %v1609_v13, 4 }
 0x399   :  { %v1744_v62 = vperm.slane %v1740_v14, %v3586_v43  ;;  %v1512_v24 = vadd.f32 %v1461_v35, %v1352_v8  ;;  %v1357_v36 = vmul.f32 %v1320_v22, %v3182_v23  ;;  %v1575_v33 = vmul.f32 0.01, %v1511_v0 }
 0x39a   :  { %vm1543_vm14 = vcmp.gt.f32.partialorder %v1511_v0, 0.0  ;;  %v1789_v14 = vrot.slane %v1610_v46, 4 }
 0x39b   :  { %v1764_v32 = vsel %vm440_vm10, %v1763_v25, %v1744_v62  ;;  %v1765_v57 = vrot.slane %v1744_v62, 4  ;;  %v1576_v2 = vmul.f32 0.01, %v1512_v24  ;;  %vm1544_vm15 = vcmp.gt.f32.partialorder %v1512_v24, 0.0 }
 0x39c   :  { %v1770_v30 = vperm.slane %v1764_v32, %v3592_v61  ;;  %v1607_v55 = vsel %vm1543_vm14, %v1511_v0, %v1575_v33 }
 0x39d   :  { %v1766_v51 = vsel %vm440_vm10, %v1750_v53, %v1765_v57  ;;  %v1517_v53 = vadd.f32 %v3607_v40, %v1357_v36  ;;  %v1608_v10 = vsel %vm1544_vm15, %v1512_v24, %v1576_v2  ;;  %v1784_v22 = vsel %vm440_vm10, %v1783_v9, %v1607_v55 }
 0x39e   :  { %v1774_v18 = vperm.slane %v1766_v51, %v3592_v61  ;;  %v1775_v39 = vrot.slane %v1770_v30, 4  ;;  %v1778_v19 = vsel %vm440_vm10, %v1770_v30, %v1777_v54  ;;  %v1310_v38 = vpop.permute.xlu1 %1309  ;;  %v1790_v25 = vsel %vm440_vm10, %v1789_v14, %v1608_v10 }
 0x39f   :  { %v1864_v52 = vadd.f32 %v1848_v44, %v1778_v19  ;;  %v1355_v49 = vmul.f32 %v1310_v38, %v3172_v56  ;;  %v1581_v48 = vmul.f32 0.01, %v1517_v53  ;;  %vm1549_vm0 = vcmp.gt.f32.partialorder %v1517_v53, 0.0 }
 0x3a0   :  { %v1776_v59 = vsel %vm440_vm10, %v1775_v39, %v1758_v20  ;;  %v1779_v27 = vrot.slane %v1774_v18, 4  ;;  %v1782_v17 = vsel %vm440_vm10, %v1774_v18, %v1781_v6  ;;  %v1788_v45 = vperm.slane %v1784_v22, %v3586_v43  ;;  %v1994_v18 = vld [vmem:[#allocation2 + $0x78] sm:$0xff] }
 0x3a1   :  { %v1863_v41 = vadd.f32 %v1847_v34, %v1776_v59  ;;  %v1866_v58 = vadd.f32 %v1850_v31, %v1782_v17  ;;  %1880 = vst [vmem:[#allocation5 + $0x48] sm:$0xff] %v1864_v52  ;;  %v1473_v47 = vpop.permute.xlu0 %1472  ;;  %v1613_v8 = vsel %vm1549_vm0, %v1517_v53, %v1581_v48  ;;  %v1794_v34 = vperm.slane %v1790_v25, %v3586_v43  ;;  %v1996_v52 = vld [vmem:[#allocation2 + $0x70] sm:$0xff] }
 0x3a2   :  { %v1780_v23 = vsel %vm440_vm10, %v1779_v27, %v1762_v3  ;;  %v1515_v1 = vadd.f32 %v1473_v47, %v1355_v49  ;;  %v3608_v3 = vld [vmem:[#allocation56_spill] sm:$0xff]  ;;  %v1795_v44 = vrot.slane %v1613_v8, 4  ;;  %v1809_v32 = vrot.slane %v1788_v45, 4 }
 0x3a3   :  { %v1865_v21 = vadd.f32 %v1849_v15, %v1780_v23  ;;  %1879 = vst [vmem:[#allocation5 + $0x40] sm:$0xff] %v1863_v41  ;;  %v1807_v57 = vrot.slane %v1794_v34, 4  ;;  %v1854_v39 = vmul.f32 2.0, %v1994_v18  ;;  %v1995_v15 = vld [vmem:[#allocation2 + $0x68] sm:$0xff]  ;;  %v1853_v59 = vmul.f32 2.0, %v1996_v52  ;;  %v1997_v41 = vld [vmem:[#allocation2 + $0x60] sm:$0xff] }
 0x3a4   :  { %1882 = vst [vmem:[#allocation5 + $0x58] sm:$0xff] %v1866_v58  ;;  %v1579_v56 = vmul.f32 0.01, %v1515_v1  ;;  %vm1547_vm1 = vcmp.gt.f32.partialorder %v1515_v1, 0.0  ;;  %v1810_v54 = vsel %vm440_vm10, %v1794_v34, %v1809_v32  ;;  %v1852_v37 = vmul.f32 2.0, %v1995_v15 }
 0x3a5   :  { %1881 = vst [vmem:[#allocation5 + $0x50] sm:$0xff] %v1865_v21  ;;  %v1808_v6 = vsel %vm440_vm10, %v1807_v57, %v1788_v45  ;;  %v1818_v0 = vperm.slane %v1810_v54, %v3592_v61  ;;  %v1851_v58 = vmul.f32 2.0, %v1997_v41 }
 0x3a6   :  { %v1325_v20 = vpop.permute.xlu1 %1324  ;;  %v1611_v35 = vsel %vm1547_vm1, %v1515_v1, %v1579_v56  ;;  %v1814_v24 = vperm.slane %v1808_v6, %v3592_v61 }
 0x3a7   :  { %v1358_v42 = vmul.f32 %v1325_v20, %v3187_v16  ;;  %v1356_v16 = vmul.f32 %v3390_v4, %v3169_v5  ;;  %v1796_v26 = vsel %vm440_vm10, %v1795_v44, %v1611_v35  ;;  %v1837_v38 = vrot.slane %v1818_v0, 4 }
 0x3a8   :  { %v1800_v30 = vperm.slane %v1796_v26, %v3586_v43  ;;  %v1833_v17 = vrot.slane %v1814_v24, 4 }
 0x3a9   :  { %v1518_v62 = vadd.f32 %v3608_v3, %v1358_v42 }
 0x3aa   :  { %v1821_v4 = vrot.slane %v1800_v30, 4 }
 0x3ab   :  { %v1582_v29 = vmul.f32 0.01, %v1518_v62  ;;  %vm1550_vm2 = vcmp.gt.f32.partialorder %v1518_v62, 0.0 }
 0x3ad   :  { %v1614_v11 = vsel %vm1550_vm2, %v1518_v62, %v1582_v29 }
 0x3ae   :  { %v1801_v60 = vrot.slane %v1614_v11, 4 }
 0x3af   :  { %v1477_v63 = vpop.permute.xlu1 %1476 }
 0x3b0   :  { %v1516_v31 = vadd.f32 %v1477_v63, %v1356_v16 }
 0x3b2   :  { %vm1548_vm3 = vcmp.gt.f32.partialorder %v1516_v31, 0.0  ;;  %v1580_v50 = vmul.f32 0.01, %v1516_v31 }
 0x3b4   :  { %v1612_v12 = vsel %vm1548_vm3, %v1516_v31, %v1580_v50 }
 0x3b5   :  { %v1802_v5 = vsel %vm440_vm10, %v1801_v60, %v1612_v12 }
 0x3b6   :  { %v1806_v51 = vperm.slane %v1802_v5, %v3586_v43 }
 0x3b8   :  { %v1819_v19 = vrot.slane %v1806_v51, 4  ;;  %v1822_v36 = vsel %vm440_vm10, %v1806_v51, %v1821_v4 }
 0x3b9   :  { %v1830_v28 = vperm.slane %v1822_v36, %v3592_v61 }
 0x3ba   :  { %v1820_v27 = vsel %vm440_vm10, %v1819_v19, %v1800_v30 }
 0x3bb   :  { %v1826_v7 = vperm.slane %v1820_v27, %v3592_v61  ;;  %v1835_v43 = vrot.slane %v1830_v28, 4  ;;  %v1838_v33 = vsel %vm440_vm10, %v1830_v28, %v1837_v38 }
 0x3bc   :  { %v1870_v47 = vadd.f32 %v1854_v39, %v1838_v33 }
 0x3bd   :  { %v1831_v23 = vrot.slane %v1826_v7, 4  ;;  %v1834_v2 = vsel %vm440_vm10, %v1826_v7, %v1833_v17  ;;  %v1836_v40 = vsel %vm440_vm10, %v1835_v43, %v1818_v0 }
 0x3be   :  { %v1868_v53 = vadd.f32 %v1852_v37, %v1834_v2  ;;  %v1869_v49 = vadd.f32 %v1853_v59, %v1836_v40  ;;  %1886 = vst [vmem:[#allocation5 + $0x78] sm:$0xff] %v1870_v47 }
 0x3bf   :  { %v1832_v61 = vsel %vm440_vm10, %v1831_v23, %v1814_v24 }
 0x3c0   :  { %v1867_v21 = vadd.f32 %v1851_v58, %v1832_v61  ;;  %1884 = vst [vmem:[#allocation5 + $0x68] sm:$0xff] %v1868_v53 }
 0x3c1   :  { %1885 = vst [vmem:[#allocation5 + $0x70] sm:$0xff] %v1869_v49 }
 0x3c2   :  { %1883 = vst [vmem:[#allocation5 + $0x60] sm:$0xff] %v1867_v21 }
 0x3c3   :  { %1899 = dma.vmem_to_hbm [thread:$0]  %s1892_s10, 2048, %s1894_s13, [#allocation4], %s2051_s17, %s2051_s17, %s2052_s18  }
 0x3c4   :  { %2048 = dma.done.wait [#allocation4], 2048  }
 0x3c5   :  { %2049 = vsyncadd [#allocation4], 4294965248 }
 0x3c6   :  { %1904 = vsyncpa [#allocation3], 1 }
 0x3c7   :  { %1905 = vsyncpa [#allocation4], 1 }

</bundles_post_ra>
